<compile_context>
chip_gen: v5e
topology: v5e:2x2
jax: 0.10.0
libtpu: 0.0.40
codegen_flags: <defaults>
</compile_context>

<pallas_src>
import jax
import jax.numpy as jnp
from jax.experimental import pallas as pl
from jax.experimental.pallas import tpu as pltpu


ACT_DT = jnp.bfloat16          # activation / weight dtype at pallas_call boundary
STRIDES = [1, 2, 2, 2]         # per-stage first-block stride (static)


# ---------------------------------------------------------------------------
# Pallas kernel factory
# ---------------------------------------------------------------------------
def _make_conv_kernel(*, has_ds, has_res, has_head, relu):
    """GEMM + epilogue kernel.

    Ref order: w, a, b, [wd, xs, bd], [r], [pool, wfc, bfc], out
      y = W @ A + b            (f32 MXU accumulation)
      y += Wd @ Xs + bd        (fused 1x1-downsample residual)   if has_ds
      y += r                   (identity residual)               if has_res
      y = relu(y)                                                 if relu
      out = Wfc @ (y @ Pool) + bfc                                if has_head
      else out = y
    """
    def kernel(*refs):
        it = iter(refs)
        w_ref = next(it)
        a_ref = next(it)
        b_ref = next(it)
        if has_ds:
            wd_ref, xs_ref, bd_ref = next(it), next(it), next(it)
        if has_res:
            r_ref = next(it)
        if has_head:
            p_ref, wfc_ref, bfc_ref = next(it), next(it), next(it)
        o_ref = next(it)

        y = jnp.dot(w_ref[...], a_ref[...], preferred_element_type=jnp.float32)
        y = y + b_ref[...]
        if has_ds:
            y = y + jnp.dot(wd_ref[...], xs_ref[...],
                            preferred_element_type=jnp.float32) + bd_ref[...]
        if has_res:
            y = y + r_ref[...].astype(jnp.float32)
        if relu:
            y = jnp.maximum(y, 0.0)
        if has_head:
            pooled = jnp.dot(y, p_ref[...], preferred_element_type=jnp.float32)  # (Cout, n)
            logits = jnp.dot(wfc_ref[...], pooled,
                             preferred_element_type=jnp.float32) + bfc_ref[...]   # (ncls, n)
            o_ref[...] = logits.astype(o_ref.dtype)
        else:
            o_ref[...] = y.astype(o_ref.dtype)

    return kernel


# ---------------------------------------------------------------------------
# Fused conv-GEMM wrapper (no padding copies, lane-dense M axis)
# ---------------------------------------------------------------------------
def fused_conv_gemm(w_mat, bias, patches, *, residual=None, ds=None, head=None,
                    relu=True):
    """out (Cout, M) = epilogue(W (Cout,K) @ patches (K,M)).

    ds   = (wd (Cout,Cin), xs (Cin,M), bd (Cout,)) fuses the residual branch's
           1x1 conv + BN into the same kernel.
    residual = precomputed identity (Cout, M).
    head = (pool_mat (M,n), wfc (ncls,Cout), bfc (ncls,)) fuses global-avg-pool + FC;
           output then is logits (ncls, n) in f32.
    """
    cout, K = w_mat.shape
    K2, M = patches.shape
    assert K == K2
    has_ds = ds is not None
    has_res = (residual is not None) and not has_ds
    has_head = head is not None

    # Split M only when it is a clean multiple of 256 (>=2 parallel grid steps on the
    # big layers -> both v7x TensorCores busy); head fusion needs the whole M in-block.
    tm = 256 if (M % 256 == 0 and not has_head) else M
    steps = M // tm

    in_arrays = [w_mat.astype(ACT_DT), patches.astype(ACT_DT),
                 bias.reshape(cout, 1).astype(jnp.float32)]
    in_specs = [
        pl.BlockSpec((cout, K), lambda i: (0, 0)),
        pl.BlockSpec((K, tm), lambda i: (0, i)),
        pl.BlockSpec((cout, 1), lambda i: (0, 0)),
    ]

    if has_ds:
        wd, xs, bd = ds
        cin = wd.shape[1]
        in_arrays += [wd.astype(ACT_DT), xs.astype(ACT_DT),
                      bd.reshape(cout, 1).astype(jnp.float32)]
        in_specs += [
            pl.BlockSpec((cout, cin), lambda i: (0, 0)),
            pl.BlockSpec((cin, tm), lambda i: (0, i)),
            pl.BlockSpec((cout, 1), lambda i: (0, 0)),
        ]
    if has_res:
        in_arrays += [residual.astype(ACT_DT)]
        in_specs += [pl.BlockSpec((cout, tm), lambda i: (0, i))]
    if has_head:
        pool_mat, wfc, bfc = head
        ncls = wfc.shape[0]
        n = pool_mat.shape[1]
        in_arrays += [pool_mat.astype(jnp.float32), wfc.astype(jnp.float32),
                      bfc.reshape(ncls, 1).astype(jnp.float32)]
        in_specs += [
            pl.BlockSpec((M, n), lambda i: (0, 0)),
            pl.BlockSpec((ncls, cout), lambda i: (0, 0)),
            pl.BlockSpec((ncls, 1), lambda i: (0, 0)),
        ]
        out_spec = pl.BlockSpec((ncls, n), lambda i: (0, 0))
        out_shape = jax.ShapeDtypeStruct((ncls, n), jnp.float32)
    else:
        out_spec = pl.BlockSpec((cout, tm), lambda i: (0, i))
        out_shape = jax.ShapeDtypeStruct((cout, M), ACT_DT)

    kernel = _make_conv_kernel(has_ds=has_ds, has_res=has_res,
                               has_head=has_head, relu=relu)
    return pl.pallas_call(
        kernel,
        grid=(steps,),
        in_specs=in_specs,
        out_specs=out_spec,
        out_shape=out_shape,
        compiler_params=pltpu.CompilerParams(
            dimension_semantics=("parallel",)),
    )(*in_arrays)


# ---------------------------------------------------------------------------
# Conv lowering helpers (XLA glue: im2col in channel-first layout, BN folding)
# ---------------------------------------------------------------------------
def _bn_fold(bn, eps=1e-5):
    scale = bn["gamma"] / jnp.sqrt(bn["var"] + eps)
    shift = bn["beta"] - bn["mean"] * scale
    return scale, shift


def _fold_weight_3x3(w_oihw, scale):
    # (Cout,Cin,3,3) -> (Cout, 9*Cin) in (ky,kx,ci) order, BN scale folded in.
    cout, cin = w_oihw.shape[0], w_oihw.shape[1]
    wm = jnp.transpose(w_oihw, (0, 2, 3, 1)).reshape(cout, 9 * cin)
    return wm * scale[:, None]


def _im2col_3x3(x, stride):
    """x: (C, n, h, w) -> patches (9*C, n*ho*wo) in (ky,kx,ci)-tap order."""
    c, n, h, w = x.shape
    ho = (h + 2 - 3) // stride + 1
    wo = (w + 2 - 3) // stride + 1
    xp = jnp.pad(x, ((0, 0), (0, 0), (1, 1), (1, 1)))
    taps = []
    for ky in range(3):
        for kx in range(3):
            taps.append(xp[:, :, ky:ky + (ho - 1) * stride + 1:stride,
                              kx:kx + (wo - 1) * stride + 1:stride])
    patches = jnp.concatenate(taps, axis=0).reshape(9 * c, n * ho * wo)
    return patches, ho, wo


def conv_bn_relu(x, w_oihw, stride, bn):
    """3x3 conv (pad=1) + folded BN + ReLU.  x: (Cin, n, h, w) -> (Cout, n, ho, wo)."""
    scale, shift = _bn_fold(bn)
    wm = _fold_weight_3x3(w_oihw, scale)
    patches, ho, wo = _im2col_3x3(x, stride)
    cout, n = w_oihw.shape[0], x.shape[1]
    out = fused_conv_gemm(wm, shift, patches, relu=True)
    return out.reshape(cout, n, ho, wo)


def basic_block_forward(p, x, stride, head=None):
    """One BasicBlock.  head=(pool_mat, wfc, bfc) fuses avg-pool+FC (final block only)."""
    cin, n, h, w = x.shape
    cout = p["conv2"].shape[0]

    # conv1 + bn1 + relu   (dropout=0.0 -> Identity)
    s1, b1 = _bn_fold(p["bn1"])
    w1 = _fold_weight_3x3(p["conv1"], s1)
    patches1, ho, wo = _im2col_3x3(x, stride)
    h1 = fused_conv_gemm(w1, b1, patches1, relu=True)          # (cout, n*ho*wo)

    # conv2 + bn2 + residual (+ pool/FC head), all in one kernel
    s2, b2 = _bn_fold(p["bn2"])
    w2 = _fold_weight_3x3(p["conv2"], s2)
    patches2, _, _ = _im2col_3x3(h1.reshape(cout, n, ho, wo), 1)

    if "down_w" in p:
        sd, bd = _bn_fold(p["down_bn"])
        wd = p["down_w"].reshape(cout, cin) * sd[:, None]
        # strided identity == centre tap (ky=1,kx=1) of the stride-s im2col of x
        xs = patches1[4 * cin:5 * cin, :]
        out = fused_conv_gemm(w2, b2, patches2, ds=(wd, xs, bd), head=head)
    else:
        res = x.reshape(cin, n * h * w)
        out = fused_conv_gemm(w2, b2, patches2, residual=res, head=head)

    if head is not None:
        return out                                   # (num_classes, n) logits^T
    return out.reshape(cout, n, ho, wo)


# ---------------------------------------------------------------------------
# Parameter construction (Kaiming fan_out, BN eval-mode stats, FC std=0.01)
# ---------------------------------------------------------------------------
def _kaiming(key, shape):
    fan_out = shape[0] * shape[2] * shape[3]
    std = (2.0 / fan_out) ** 0.5
    return jax.random.normal(key, shape, jnp.float32) * std


def _bn_init(c):
    return dict(gamma=jnp.ones((c,), jnp.float32),
                beta=jnp.zeros((c,), jnp.float32),
                mean=jnp.zeros((c,), jnp.float32),
                var=jnp.ones((c,), jnp.float32))


def make_block_params(key, cin, cout, stride):
    k1, k2, k3 = jax.random.split(key, 3)
    p = dict(conv1=_kaiming(k1, (cout, cin, 3, 3)), bn1=_bn_init(cout),
             conv2=_kaiming(k2, (cout, cout, 3, 3)), bn2=_bn_init(cout))
    if stride != 1 or cin != cout:
        p["down_w"] = _kaiming(k3, (cout, cin, 1, 1))
        p["down_bn"] = _bn_init(cout)
    return p


def make_resnet_params(key, in_channels, widths, layers, num_classes):
    keys = jax.random.split(key, 2 + sum(layers))
    params = dict(
        stem_w=_kaiming(keys[0], (widths[0], in_channels, 3, 3)),
        stem_bn=_bn_init(widths[0]),
        stages=[],
    )
    in_planes = widths[0]
    ki = 1
    for num_blocks, planes, stride in zip(layers, widths, STRIDES):
        stage = []
        for b in range(num_blocks):
            s = stride if b == 0 else 1
            stage.append(make_block_params(keys[ki], in_planes, planes, s))
            in_planes = planes
            ki += 1
        params["stages"].append(stage)
    params["fc_w"] = jax.random.normal(keys[ki], (num_classes, widths[-1]),
                                       jnp.float32) * 0.01
    params["fc_b"] = jnp.zeros((num_classes,), jnp.float32)
    return params


# ---------------------------------------------------------------------------
# Forward pass
# ---------------------------------------------------------------------------
def resnet_forward(params, x_nchw):
    # NCHW -> channel-first (C, N, H, W); activations kept bf16 between kernels.
    n = x_nchw.shape[0]
    x = jnp.transpose(x_nchw, (1, 0, 2, 3)).astype(ACT_DT)

    x = conv_bn_relu(x, params["stem_w"], 1, params["stem_bn"])

    # Flatten (block, stride) schedule.
    blocks = []
    for stage_idx, stage in enumerate(params["stages"]):
        for b_idx, blk in enumerate(stage):
            blocks.append((blk, STRIDES[stage_idx] if b_idx == 0 else 1))

    for idx, (blk, stride) in enumerate(blocks):
        is_last = idx == len(blocks) - 1
        if not is_last:
            x = basic_block_forward(blk, x, stride)
            continue
        # Last block: fuse AdaptiveAvgPool2d(1) + flatten + Linear into its kernel.
        _, _, h, w = x.shape
        ho = (h + 2 - 3) // stride + 1
        wo = (w + 2 - 3) // stride + 1
        hw = ho * wo
        pool_mat = jnp.repeat(jnp.eye(n, dtype=jnp.float32), hw, axis=0) / float(hw)
        head = (pool_mat, params["fc_w"], params["fc_b"])
        logits_t = basic_block_forward(blk, x, stride, head=head)  # (num_classes, n)
        return jnp.transpose(logits_t, (1, 0))                      # (N, num_classes)


if __name__ == "__main__":
    batch, in_channels, hw_in = 2, 4, 16
    widths = [8, 16, 32, 64]
    layers = [1, 1, 1, 1]
    num_classes = 10

    key = jax.random.PRNGKey(0)
    kx, kp = jax.random.split(key)
    x = jax.random.normal(kx, (batch, in_channels, hw_in, hw_in), jnp.float32)
    params = make_resnet_params(kp, in_channels, widths, layers, num_classes)

    fwd = jax.jit(resnet_forward)
    logits = fwd(params, x)
    jax.block_until_ready(logits)
    assert logits.shape == (batch, num_classes)
    assert bool(jnp.all(jnp.isfinite(logits)))
    print("KERNEL_OK")
</pallas_src>

<mosaic_0001>
module attributes {stable_mosaic.version = 11 : i64} {
  func.func @kernel(%arg0: i32, %arg1: memref<8x36xbf16, #tpu.memory_space<vmem>>, %arg2: memref<36x256xbf16, #tpu.memory_space<vmem>>, %arg3: memref<8x1xf32, #tpu.memory_space<vmem>>, %arg4: memref<8x256xbf16, #tpu.memory_space<vmem>>) attributes {dimension_semantics = [#tpu.dimension_semantics<parallel>], iteration_bounds = array<i64: 2>, scalar_prefetch = 0 : i64, scratch_operands = 0 : i64, tpu.core_type = #tpu.core_type<tc>, window_params = [{pipeline_mode = #tpu.pipeline_mode<synchronous>, transform_indices = @transform_0, window_bounds = array<i64: 8, 36>}, {transform_indices = @transform_1, window_bounds = array<i64: 36, 256>}, {pipeline_mode = #tpu.pipeline_mode<synchronous>, transform_indices = @transform_2, window_bounds = array<i64: 8, 1>}, {transform_indices = @transform_3, window_bounds = array<i64: 8, 256>}]} {
    %c0 = arith.constant 0 : index
    %c0_0 = arith.constant 0 : index
    %0 = vector.load %arg1[%c0, %c0_0] : memref<8x36xbf16, #tpu.memory_space<vmem>>, vector<8x36xbf16>
    %c0_1 = arith.constant 0 : index
    %c0_2 = arith.constant 0 : index
    %1 = vector.load %arg2[%c0_1, %c0_2] : memref<36x256xbf16, #tpu.memory_space<vmem>>, vector<36x256xbf16>
    %cst = arith.constant dense<0.000000e+00> : vector<8x256xf32>
    %2 = tpu.matmul %0, %1, %cst {dimension_numbers = #tpu.dot_dimension_numbers<[1], [0], [0], [1], [0, 0, 1, 1], [], []>} : vector<8x36xbf16>, vector<36x256xbf16>, vector<8x256xf32> -> vector<8x256xf32>
    %c0_3 = arith.constant 0 : index
    %c0_4 = arith.constant 0 : index
    %3 = vector.load %arg3[%c0_3, %c0_4] : memref<8x1xf32, #tpu.memory_space<vmem>>, vector<8x1xf32>
    %4 = vector.broadcast %3 : vector<8x1xf32> to vector<8x256xf32>
    %5 = arith.addf %2, %4 : vector<8x256xf32>
    %cst_5 = arith.constant 0.000000e+00 : f32
    %6 = vector.broadcast %cst_5 : f32 to vector<8x256xf32>
    %7 = arith.maximumf %5, %6 : vector<8x256xf32>
    %8 = arith.truncf %7 : vector<8x256xf32> to vector<8x256xbf16>
    %c0_6 = arith.constant 0 : index
    %c0_7 = arith.constant 0 : index
    %9 = vector.load %arg4[%c0_6, %c0_7] : memref<8x256xbf16, #tpu.memory_space<vmem>>, vector<8x256xbf16>
    tpu.vector_store %arg4[%c0_6, %c0_7], %8 {strides = array<i32>} : memref<8x256xbf16, #tpu.memory_space<vmem>>, vector<8x256xbf16>,
    return
  }
  func.func @transform_0(%arg0: i32) -> (i32, i32) {
    %c0_i32 = arith.constant 0 : i32
    %c0_i32_0 = arith.constant 0 : i32
    %c0_i32_1 = arith.constant 0 : i32
    return %c0_i32, %c0_i32_0 : i32, i32
  }
  func.func @transform_1(%arg0: i32) -> (i32, i32) {
    %c0_i32 = arith.constant 0 : i32
    %c0_i32_0 = arith.constant 0 : i32
    return %c0_i32, %arg0 : i32, i32
  }
  func.func @transform_2(%arg0: i32) -> (i32, i32) {
    %c0_i32 = arith.constant 0 : i32
    %c0_i32_0 = arith.constant 0 : i32
    %c0_i32_1 = arith.constant 0 : i32
    return %c0_i32, %c0_i32_0 : i32, i32
  }
  func.func @transform_3(%arg0: i32) -> (i32, i32) {
    %c0_i32 = arith.constant 0 : i32
    %c0_i32_0 = arith.constant 0 : i32
    return %c0_i32, %arg0 : i32, i32
  }
}

module attributes {stable_mosaic.version = 11 : i64} {
  func.func @kernel(%arg0: i32, %arg1: memref<8x72xbf16, #tpu.memory_space<vmem>>, %arg2: memref<72x256xbf16, #tpu.memory_space<vmem>>, %arg3: memref<8x1xf32, #tpu.memory_space<vmem>>, %arg4: memref<8x256xbf16, #tpu.memory_space<vmem>>, %arg5: memref<8x256xbf16, #tpu.memory_space<vmem>>) attributes {dimension_semantics = [#tpu.dimension_semantics<parallel>], iteration_bounds = array<i64: 2>, scalar_prefetch = 0 : i64, scratch_operands = 0 : i64, tpu.core_type = #tpu.core_type<tc>, window_params = [{pipeline_mode = #tpu.pipeline_mode<synchronous>, transform_indices = @transform_0, window_bounds = array<i64: 8, 72>}, {transform_indices = @transform_1, window_bounds = array<i64: 72, 256>}, {pipeline_mode = #tpu.pipeline_mode<synchronous>, transform_indices = @transform_2, window_bounds = array<i64: 8, 1>}, {transform_indices = @transform_3, window_bounds = array<i64: 8, 256>}, {transform_indices = @transform_4, window_bounds = array<i64: 8, 256>}]} {
    %c0 = arith.constant 0 : index
    %c0_0 = arith.constant 0 : index
    %0 = vector.load %arg1[%c0, %c0_0] : memref<8x72xbf16, #tpu.memory_space<vmem>>, vector<8x72xbf16>
    %c0_1 = arith.constant 0 : index
    %c0_2 = arith.constant 0 : index
    %1 = vector.load %arg2[%c0_1, %c0_2] : memref<72x256xbf16, #tpu.memory_space<vmem>>, vector<72x256xbf16>
    %cst = arith.constant dense<0.000000e+00> : vector<8x256xf32>
    %2 = tpu.matmul %0, %1, %cst {dimension_numbers = #tpu.dot_dimension_numbers<[1], [0], [0], [1], [0, 0, 1, 1], [], []>} : vector<8x72xbf16>, vector<72x256xbf16>, vector<8x256xf32> -> vector<8x256xf32>
    %c0_3 = arith.constant 0 : index
    %c0_4 = arith.constant 0 : index
    %3 = vector.load %arg3[%c0_3, %c0_4] : memref<8x1xf32, #tpu.memory_space<vmem>>, vector<8x1xf32>
    %4 = vector.broadcast %3 : vector<8x1xf32> to vector<8x256xf32>
    %5 = arith.addf %2, %4 : vector<8x256xf32>
    %c0_5 = arith.constant 0 : index
    %c0_6 = arith.constant 0 : index
    %6 = vector.load %arg4[%c0_5, %c0_6] : memref<8x256xbf16, #tpu.memory_space<vmem>>, vector<8x256xbf16>
    %7 = arith.extf %6 : vector<8x256xbf16> to vector<8x256xf32>
    %8 = arith.addf %5, %7 : vector<8x256xf32>
    %cst_7 = arith.constant 0.000000e+00 : f32
    %9 = vector.broadcast %cst_7 : f32 to vector<8x256xf32>
    %10 = arith.maximumf %8, %9 : vector<8x256xf32>
    %11 = arith.truncf %10 : vector<8x256xf32> to vector<8x256xbf16>
    %c0_8 = arith.constant 0 : index
    %c0_9 = arith.constant 0 : index
    %12 = vector.load %arg5[%c0_8, %c0_9] : memref<8x256xbf16, #tpu.memory_space<vmem>>, vector<8x256xbf16>
    tpu.vector_store %arg5[%c0_8, %c0_9], %11 {strides = array<i32>} : memref<8x256xbf16, #tpu.memory_space<vmem>>, vector<8x256xbf16>,
    return
  }
  func.func @transform_0(%arg0: i32) -> (i32, i32) {
    %c0_i32 = arith.constant 0 : i32
    %c0_i32_0 = arith.constant 0 : i32
    %c0_i32_1 = arith.constant 0 : i32
    return %c0_i32, %c0_i32_0 : i32, i32
  }
  func.func @transform_1(%arg0: i32) -> (i32, i32) {
    %c0_i32 = arith.constant 0 : i32
    %c0_i32_0 = arith.constant 0 : i32
    return %c0_i32, %arg0 : i32, i32
  }
  func.func @transform_2(%arg0: i32) -> (i32, i32) {
    %c0_i32 = arith.constant 0 : i32
    %c0_i32_0 = arith.constant 0 : i32
    %c0_i32_1 = arith.constant 0 : i32
    return %c0_i32, %c0_i32_0 : i32, i32
  }
  func.func @transform_3(%arg0: i32) -> (i32, i32) {
    %c0_i32 = arith.constant 0 : i32
    %c0_i32_0 = arith.constant 0 : i32
    return %c0_i32, %arg0 : i32, i32
  }
  func.func @transform_4(%arg0: i32) -> (i32, i32) {
    %c0_i32 = arith.constant 0 : i32
    %c0_i32_0 = arith.constant 0 : i32
    return %c0_i32, %arg0 : i32, i32
  }
}

module attributes {stable_mosaic.version = 11 : i64} {
  func.func @kernel(%arg0: i32, %arg1: memref<8x72xbf16, #tpu.memory_space<vmem>>, %arg2: memref<72x256xbf16, #tpu.memory_space<vmem>>, %arg3: memref<8x1xf32, #tpu.memory_space<vmem>>, %arg4: memref<8x256xbf16, #tpu.memory_space<vmem>>) attributes {dimension_semantics = [#tpu.dimension_semantics<parallel>], iteration_bounds = array<i64: 2>, scalar_prefetch = 0 : i64, scratch_operands = 0 : i64, tpu.core_type = #tpu.core_type<tc>, window_params = [{pipeline_mode = #tpu.pipeline_mode<synchronous>, transform_indices = @transform_0, window_bounds = array<i64: 8, 72>}, {transform_indices = @transform_1, window_bounds = array<i64: 72, 256>}, {pipeline_mode = #tpu.pipeline_mode<synchronous>, transform_indices = @transform_2, window_bounds = array<i64: 8, 1>}, {transform_indices = @transform_3, window_bounds = array<i64: 8, 256>}]} {
    %c0 = arith.constant 0 : index
    %c0_0 = arith.constant 0 : index
    %0 = vector.load %arg1[%c0, %c0_0] : memref<8x72xbf16, #tpu.memory_space<vmem>>, vector<8x72xbf16>
    %c0_1 = arith.constant 0 : index
    %c0_2 = arith.constant 0 : index
    %1 = vector.load %arg2[%c0_1, %c0_2] : memref<72x256xbf16, #tpu.memory_space<vmem>>, vector<72x256xbf16>
    %cst = arith.constant dense<0.000000e+00> : vector<8x256xf32>
    %2 = tpu.matmul %0, %1, %cst {dimension_numbers = #tpu.dot_dimension_numbers<[1], [0], [0], [1], [0, 0, 1, 1], [], []>} : vector<8x72xbf16>, vector<72x256xbf16>, vector<8x256xf32> -> vector<8x256xf32>
    %c0_3 = arith.constant 0 : index
    %c0_4 = arith.constant 0 : index
    %3 = vector.load %arg3[%c0_3, %c0_4] : memref<8x1xf32, #tpu.memory_space<vmem>>, vector<8x1xf32>
    %4 = vector.broadcast %3 : vector<8x1xf32> to vector<8x256xf32>
    %5 = arith.addf %2, %4 : vector<8x256xf32>
    %cst_5 = arith.constant 0.000000e+00 : f32
    %6 = vector.broadcast %cst_5 : f32 to vector<8x256xf32>
    %7 = arith.maximumf %5, %6 : vector<8x256xf32>
    %8 = arith.truncf %7 : vector<8x256xf32> to vector<8x256xbf16>
    %c0_6 = arith.constant 0 : index
    %c0_7 = arith.constant 0 : index
    %9 = vector.load %arg4[%c0_6, %c0_7] : memref<8x256xbf16, #tpu.memory_space<vmem>>, vector<8x256xbf16>
    tpu.vector_store %arg4[%c0_6, %c0_7], %8 {strides = array<i32>} : memref<8x256xbf16, #tpu.memory_space<vmem>>, vector<8x256xbf16>,
    return
  }
  func.func @transform_0(%arg0: i32) -> (i32, i32) {
    %c0_i32 = arith.constant 0 : i32
    %c0_i32_0 = arith.constant 0 : i32
    %c0_i32_1 = arith.constant 0 : i32
    return %c0_i32, %c0_i32_0 : i32, i32
  }
  func.func @transform_1(%arg0: i32) -> (i32, i32) {
    %c0_i32 = arith.constant 0 : i32
    %c0_i32_0 = arith.constant 0 : i32
    return %c0_i32, %arg0 : i32, i32
  }
  func.func @transform_2(%arg0: i32) -> (i32, i32) {
    %c0_i32 = arith.constant 0 : i32
    %c0_i32_0 = arith.constant 0 : i32
    %c0_i32_1 = arith.constant 0 : i32
    return %c0_i32, %c0_i32_0 : i32, i32
  }
  func.func @transform_3(%arg0: i32) -> (i32, i32) {
    %c0_i32 = arith.constant 0 : i32
    %c0_i32_0 = arith.constant 0 : i32
    return %c0_i32, %arg0 : i32, i32
  }
}

module attributes {stable_mosaic.version = 11 : i64} {
  func.func @kernel(%arg0: i32, %arg1: memref<16x72xbf16, #tpu.memory_space<vmem>>, %arg2: memref<72x128xbf16, #tpu.memory_space<vmem>>, %arg3: memref<16x1xf32, #tpu.memory_space<vmem>>, %arg4: memref<16x128xbf16, #tpu.memory_space<vmem>>) attributes {dimension_semantics = [#tpu.dimension_semantics<parallel>], iteration_bounds = array<i64: 1>, scalar_prefetch = 0 : i64, scratch_operands = 0 : i64, tpu.core_type = #tpu.core_type<tc>, window_params = [{pipeline_mode = #tpu.pipeline_mode<synchronous>, transform_indices = @transform_0, window_bounds = array<i64: 16, 72>}, {transform_indices = @transform_1, window_bounds = array<i64: 72, 128>}, {pipeline_mode = #tpu.pipeline_mode<synchronous>, transform_indices = @transform_2, window_bounds = array<i64: 16, 1>}, {transform_indices = @transform_3, window_bounds = array<i64: 16, 128>}]} {
    %c0 = arith.constant 0 : index
    %c0_0 = arith.constant 0 : index
    %0 = vector.load %arg1[%c0, %c0_0] : memref<16x72xbf16, #tpu.memory_space<vmem>>, vector<16x72xbf16>
    %c0_1 = arith.constant 0 : index
    %c0_2 = arith.constant 0 : index
    %1 = vector.load %arg2[%c0_1, %c0_2] : memref<72x128xbf16, #tpu.memory_space<vmem>>, vector<72x128xbf16>
    %cst = arith.constant dense<0.000000e+00> : vector<16x128xf32>
    %2 = tpu.matmul %0, %1, %cst {dimension_numbers = #tpu.dot_dimension_numbers<[1], [0], [0], [1], [0, 0, 1, 1], [], []>} : vector<16x72xbf16>, vector<72x128xbf16>, vector<16x128xf32> -> vector<16x128xf32>
    %c0_3 = arith.constant 0 : index
    %c0_4 = arith.constant 0 : index
    %3 = vector.load %arg3[%c0_3, %c0_4] : memref<16x1xf32, #tpu.memory_space<vmem>>, vector<16x1xf32>
    %4 = vector.broadcast %3 : vector<16x1xf32> to vector<16x128xf32>
    %5 = arith.addf %2, %4 : vector<16x128xf32>
    %cst_5 = arith.constant 0.000000e+00 : f32
    %6 = vector.broadcast %cst_5 : f32 to vector<16x128xf32>
    %7 = arith.maximumf %5, %6 : vector<16x128xf32>
    %8 = arith.truncf %7 : vector<16x128xf32> to vector<16x128xbf16>
    %c0_6 = arith.constant 0 : index
    %c0_7 = arith.constant 0 : index
    %9 = vector.load %arg4[%c0_6, %c0_7] : memref<16x128xbf16, #tpu.memory_space<vmem>>, vector<16x128xbf16>
    tpu.vector_store %arg4[%c0_6, %c0_7], %8 {strides = array<i32>} : memref<16x128xbf16, #tpu.memory_space<vmem>>, vector<16x128xbf16>,
    return
  }
  func.func @transform_0(%arg0: i32) -> (i32, i32) {
    %c0_i32 = arith.constant 0 : i32
    %c0_i32_0 = arith.constant 0 : i32
    %c0_i32_1 = arith.constant 0 : i32
    return %c0_i32, %c0_i32_0 : i32, i32
  }
  func.func @transform_1(%arg0: i32) -> (i32, i32) {
    %c0_i32 = arith.constant 0 : i32
    %c0_i32_0 = arith.constant 0 : i32
    return %c0_i32, %arg0 : i32, i32
  }
  func.func @transform_2(%arg0: i32) -> (i32, i32) {
    %c0_i32 = arith.constant 0 : i32
    %c0_i32_0 = arith.constant 0 : i32
    %c0_i32_1 = arith.constant 0 : i32
    return %c0_i32, %c0_i32_0 : i32, i32
  }
  func.func @transform_3(%arg0: i32) -> (i32, i32) {
    %c0_i32 = arith.constant 0 : i32
    %c0_i32_0 = arith.constant 0 : i32
    return %c0_i32, %arg0 : i32, i32
  }
}

module attributes {stable_mosaic.version = 11 : i64} {
  func.func @kernel(%arg0: i32, %arg1: memref<16x144xbf16, #tpu.memory_space<vmem>>, %arg2: memref<144x128xbf16, #tpu.memory_space<vmem>>, %arg3: memref<16x1xf32, #tpu.memory_space<vmem>>, %arg4: memref<16x8xbf16, #tpu.memory_space<vmem>>, %arg5: memref<8x128xbf16, #tpu.memory_space<vmem>>, %arg6: memref<16x1xf32, #tpu.memory_space<vmem>>, %arg7: memref<16x128xbf16, #tpu.memory_space<vmem>>) attributes {dimension_semantics = [#tpu.dimension_semantics<parallel>], iteration_bounds = array<i64: 1>, scalar_prefetch = 0 : i64, scratch_operands = 0 : i64, tpu.core_type = #tpu.core_type<tc>, window_params = [{pipeline_mode = #tpu.pipeline_mode<synchronous>, transform_indices = @transform_0, window_bounds = array<i64: 16, 144>}, {transform_indices = @transform_1, window_bounds = array<i64: 144, 128>}, {pipeline_mode = #tpu.pipeline_mode<synchronous>, transform_indices = @transform_2, window_bounds = array<i64: 16, 1>}, {pipeline_mode = #tpu.pipeline_mode<synchronous>, transform_indices = @transform_3, window_bounds = array<i64: 16, 8>}, {transform_indices = @transform_4, window_bounds = array<i64: 8, 128>}, {pipeline_mode = #tpu.pipeline_mode<synchronous>, transform_indices = @transform_5, window_bounds = array<i64: 16, 1>}, {transform_indices = @transform_6, window_bounds = array<i64: 16, 128>}]} {
    %c0 = arith.constant 0 : index
    %c0_0 = arith.constant 0 : index
    %0 = vector.load %arg1[%c0, %c0_0] : memref<16x144xbf16, #tpu.memory_space<vmem>>, vector<16x144xbf16>
    %c0_1 = arith.constant 0 : index
    %c0_2 = arith.constant 0 : index
    %1 = vector.load %arg2[%c0_1, %c0_2] : memref<144x128xbf16, #tpu.memory_space<vmem>>, vector<144x128xbf16>
    %cst = arith.constant dense<0.000000e+00> : vector<16x128xf32>
    %2 = tpu.matmul %0, %1, %cst {dimension_numbers = #tpu.dot_dimension_numbers<[1], [0], [0], [1], [0, 0, 1, 1], [], []>} : vector<16x144xbf16>, vector<144x128xbf16>, vector<16x128xf32> -> vector<16x128xf32>
    %c0_3 = arith.constant 0 : index
    %c0_4 = arith.constant 0 : index
    %3 = vector.load %arg3[%c0_3, %c0_4] : memref<16x1xf32, #tpu.memory_space<vmem>>, vector<16x1xf32>
    %4 = vector.broadcast %3 : vector<16x1xf32> to vector<16x128xf32>
    %5 = arith.addf %2, %4 : vector<16x128xf32>
    %c0_5 = arith.constant 0 : index
    %c0_6 = arith.constant 0 : index
    %6 = vector.load %arg4[%c0_5, %c0_6] : memref<16x8xbf16, #tpu.memory_space<vmem>>, vector<16x8xbf16>
    %c0_7 = arith.constant 0 : index
    %c0_8 = arith.constant 0 : index
    %7 = vector.load %arg5[%c0_7, %c0_8] : memref<8x128xbf16, #tpu.memory_space<vmem>>, vector<8x128xbf16>
    %cst_9 = arith.constant dense<0.000000e+00> : vector<16x128xf32>
    %8 = tpu.matmul %6, %7, %cst_9 {dimension_numbers = #tpu.dot_dimension_numbers<[1], [0], [0], [1], [0, 0, 1, 1], [], []>} : vector<16x8xbf16>, vector<8x128xbf16>, vector<16x128xf32> -> vector<16x128xf32>
    %9 = arith.addf %5, %8 : vector<16x128xf32>
    %c0_10 = arith.constant 0 : index
    %c0_11 = arith.constant 0 : index
    %10 = vector.load %arg6[%c0_10, %c0_11] : memref<16x1xf32, #tpu.memory_space<vmem>>, vector<16x1xf32>
    %11 = vector.broadcast %10 : vector<16x1xf32> to vector<16x128xf32>
    %12 = arith.addf %9, %11 : vector<16x128xf32>
    %cst_12 = arith.constant 0.000000e+00 : f32
    %13 = vector.broadcast %cst_12 : f32 to vector<16x128xf32>
    %14 = arith.maximumf %12, %13 : vector<16x128xf32>
    %15 = arith.truncf %14 : vector<16x128xf32> to vector<16x128xbf16>
    %c0_13 = arith.constant 0 : index
    %c0_14 = arith.constant 0 : index
    %16 = vector.load %arg7[%c0_13, %c0_14] : memref<16x128xbf16, #tpu.memory_space<vmem>>, vector<16x128xbf16>
    tpu.vector_store %arg7[%c0_13, %c0_14], %15 {strides = array<i32>} : memref<16x128xbf16, #tpu.memory_space<vmem>>, vector<16x128xbf16>,
    return
  }
  func.func @transform_0(%arg0: i32) -> (i32, i32) {
    %c0_i32 = arith.constant 0 : i32
    %c0_i32_0 = arith.constant 0 : i32
    %c0_i32_1 = arith.constant 0 : i32
    return %c0_i32, %c0_i32_0 : i32, i32
  }
  func.func @transform_1(%arg0: i32) -> (i32, i32) {
    %c0_i32 = arith.constant 0 : i32
    %c0_i32_0 = arith.constant 0 : i32
    return %c0_i32, %arg0 : i32, i32
  }
  func.func @transform_2(%arg0: i32) -> (i32, i32) {
    %c0_i32 = arith.constant 0 : i32
    %c0_i32_0 = arith.constant 0 : i32
    %c0_i32_1 = arith.constant 0 : i32
    return %c0_i32, %c0_i32_0 : i32, i32
  }
  func.func @transform_3(%arg0: i32) -> (i32, i32) {
    %c0_i32 = arith.constant 0 : i32
    %c0_i32_0 = arith.constant 0 : i32
    %c0_i32_1 = arith.constant 0 : i32
    return %c0_i32, %c0_i32_0 : i32, i32
  }
  func.func @transform_4(%arg0: i32) -> (i32, i32) {
    %c0_i32 = arith.constant 0 : i32
    %c0_i32_0 = arith.constant 0 : i32
    return %c0_i32, %arg0 : i32, i32
  }
  func.func @transform_5(%arg0: i32) -> (i32, i32) {
    %c0_i32 = arith.constant 0 : i32
    %c0_i32_0 = arith.constant 0 : i32
    %c0_i32_1 = arith.constant 0 : i32
    return %c0_i32, %c0_i32_0 : i32, i32
  }
  func.func @transform_6(%arg0: i32) -> (i32, i32) {
    %c0_i32 = arith.constant 0 : i32
    %c0_i32_0 = arith.constant 0 : i32
    return %c0_i32, %arg0 : i32, i32
  }
}

module attributes {stable_mosaic.version = 11 : i64} {
  func.func @kernel(%arg0: i32, %arg1: memref<32x144xbf16, #tpu.memory_space<vmem>>, %arg2: memref<144x32xbf16, #tpu.memory_space<vmem>>, %arg3: memref<32x1xf32, #tpu.memory_space<vmem>>, %arg4: memref<32x32xbf16, #tpu.memory_space<vmem>>) attributes {dimension_semantics = [#tpu.dimension_semantics<parallel>], iteration_bounds = array<i64: 1>, scalar_prefetch = 0 : i64, scratch_operands = 0 : i64, tpu.core_type = #tpu.core_type<tc>, window_params = [{pipeline_mode = #tpu.pipeline_mode<synchronous>, transform_indices = @transform_0, window_bounds = array<i64: 32, 144>}, {transform_indices = @transform_1, window_bounds = array<i64: 144, 32>}, {pipeline_mode = #tpu.pipeline_mode<synchronous>, transform_indices = @transform_2, window_bounds = array<i64: 32, 1>}, {transform_indices = @transform_3, window_bounds = array<i64: 32, 32>}]} {
    %c0 = arith.constant 0 : index
    %c0_0 = arith.constant 0 : index
    %0 = vector.load %arg1[%c0, %c0_0] : memref<32x144xbf16, #tpu.memory_space<vmem>>, vector<32x144xbf16>
    %c0_1 = arith.constant 0 : index
    %c0_2 = arith.constant 0 : index
    %1 = vector.load %arg2[%c0_1, %c0_2] : memref<144x32xbf16, #tpu.memory_space<vmem>>, vector<144x32xbf16>
    %cst = arith.constant dense<0.000000e+00> : vector<32x32xf32>
    %2 = tpu.matmul %0, %1, %cst {dimension_numbers = #tpu.dot_dimension_numbers<[1], [0], [0], [1], [0, 0, 1, 1], [], []>} : vector<32x144xbf16>, vector<144x32xbf16>, vector<32x32xf32> -> vector<32x32xf32>
    %c0_3 = arith.constant 0 : index
    %c0_4 = arith.constant 0 : index
    %3 = vector.load %arg3[%c0_3, %c0_4] : memref<32x1xf32, #tpu.memory_space<vmem>>, vector<32x1xf32>
    %4 = vector.broadcast %3 : vector<32x1xf32> to vector<32x32xf32>
    %5 = arith.addf %2, %4 : vector<32x32xf32>
    %cst_5 = arith.constant 0.000000e+00 : f32
    %6 = vector.broadcast %cst_5 : f32 to vector<32x32xf32>
    %7 = arith.maximumf %5, %6 : vector<32x32xf32>
    %8 = arith.truncf %7 : vector<32x32xf32> to vector<32x32xbf16>
    %c0_6 = arith.constant 0 : index
    %c0_7 = arith.constant 0 : index
    %9 = vector.load %arg4[%c0_6, %c0_7] : memref<32x32xbf16, #tpu.memory_space<vmem>>, vector<32x32xbf16>
    tpu.vector_store %arg4[%c0_6, %c0_7], %8 {strides = array<i32>} : memref<32x32xbf16, #tpu.memory_space<vmem>>, vector<32x32xbf16>,
    return
  }
  func.func @transform_0(%arg0: i32) -> (i32, i32) {
    %c0_i32 = arith.constant 0 : i32
    %c0_i32_0 = arith.constant 0 : i32
    %c0_i32_1 = arith.constant 0 : i32
    return %c0_i32, %c0_i32_0 : i32, i32
  }
  func.func @transform_1(%arg0: i32) -> (i32, i32) {
    %c0_i32 = arith.constant 0 : i32
    %c0_i32_0 = arith.constant 0 : i32
    return %c0_i32, %arg0 : i32, i32
  }
  func.func @transform_2(%arg0: i32) -> (i32, i32) {
    %c0_i32 = arith.constant 0 : i32
    %c0_i32_0 = arith.constant 0 : i32
    %c0_i32_1 = arith.constant 0 : i32
    return %c0_i32, %c0_i32_0 : i32, i32
  }
  func.func @transform_3(%arg0: i32) -> (i32, i32) {
    %c0_i32 = arith.constant 0 : i32
    %c0_i32_0 = arith.constant 0 : i32
    return %c0_i32, %arg0 : i32, i32
  }
}

module attributes {stable_mosaic.version = 11 : i64} {
  func.func @kernel(%arg0: i32, %arg1: memref<32x288xbf16, #tpu.memory_space<vmem>>, %arg2: memref<288x32xbf16, #tpu.memory_space<vmem>>, %arg3: memref<32x1xf32, #tpu.memory_space<vmem>>, %arg4: memref<32x16xbf16, #tpu.memory_space<vmem>>, %arg5: memref<16x32xbf16, #tpu.memory_space<vmem>>, %arg6: memref<32x1xf32, #tpu.memory_space<vmem>>, %arg7: memref<32x32xbf16, #tpu.memory_space<vmem>>) attributes {dimension_semantics = [#tpu.dimension_semantics<parallel>], iteration_bounds = array<i64: 1>, scalar_prefetch = 0 : i64, scratch_operands = 0 : i64, tpu.core_type = #tpu.core_type<tc>, window_params = [{pipeline_mode = #tpu.pipeline_mode<synchronous>, transform_indices = @transform_0, window_bounds = array<i64: 32, 288>}, {transform_indices = @transform_1, window_bounds = array<i64: 288, 32>}, {pipeline_mode = #tpu.pipeline_mode<synchronous>, transform_indices = @transform_2, window_bounds = array<i64: 32, 1>}, {pipeline_mode = #tpu.pipeline_mode<synchronous>, transform_indices = @transform_3, window_bounds = array<i64: 32, 16>}, {transform_indices = @transform_4, window_bounds = array<i64: 16, 32>}, {pipeline_mode = #tpu.pipeline_mode<synchronous>, transform_indices = @transform_5, window_bounds = array<i64: 32, 1>}, {transform_indices = @transform_6, window_bounds = array<i64: 32, 32>}]} {
    %c0 = arith.constant 0 : index
    %c0_0 = arith.constant 0 : index
    %0 = vector.load %arg1[%c0, %c0_0] : memref<32x288xbf16, #tpu.memory_space<vmem>>, vector<32x288xbf16>
    %c0_1 = arith.constant 0 : index
    %c0_2 = arith.constant 0 : index
    %1 = vector.load %arg2[%c0_1, %c0_2] : memref<288x32xbf16, #tpu.memory_space<vmem>>, vector<288x32xbf16>
    %cst = arith.constant dense<0.000000e+00> : vector<32x32xf32>
    %2 = tpu.matmul %0, %1, %cst {dimension_numbers = #tpu.dot_dimension_numbers<[1], [0], [0], [1], [0, 0, 1, 1], [], []>} : vector<32x288xbf16>, vector<288x32xbf16>, vector<32x32xf32> -> vector<32x32xf32>
    %c0_3 = arith.constant 0 : index
    %c0_4 = arith.constant 0 : index
    %3 = vector.load %arg3[%c0_3, %c0_4] : memref<32x1xf32, #tpu.memory_space<vmem>>, vector<32x1xf32>
    %4 = vector.broadcast %3 : vector<32x1xf32> to vector<32x32xf32>
    %5 = arith.addf %2, %4 : vector<32x32xf32>
    %c0_5 = arith.constant 0 : index
    %c0_6 = arith.constant 0 : index
    %6 = vector.load %arg4[%c0_5, %c0_6] : memref<32x16xbf16, #tpu.memory_space<vmem>>, vector<32x16xbf16>
    %c0_7 = arith.constant 0 : index
    %c0_8 = arith.constant 0 : index
    %7 = vector.load %arg5[%c0_7, %c0_8] : memref<16x32xbf16, #tpu.memory_space<vmem>>, vector<16x32xbf16>
    %cst_9 = arith.constant dense<0.000000e+00> : vector<32x32xf32>
    %8 = tpu.matmul %6, %7, %cst_9 {dimension_numbers = #tpu.dot_dimension_numbers<[1], [0], [0], [1], [0, 0, 1, 1], [], []>} : vector<32x16xbf16>, vector<16x32xbf16>, vector<32x32xf32> -> vector<32x32xf32>
    %9 = arith.addf %5, %8 : vector<32x32xf32>
    %c0_10 = arith.constant 0 : index
    %c0_11 = arith.constant 0 : index
    %10 = vector.load %arg6[%c0_10, %c0_11] : memref<32x1xf32, #tpu.memory_space<vmem>>, vector<32x1xf32>
    %11 = vector.broadcast %10 : vector<32x1xf32> to vector<32x32xf32>
    %12 = arith.addf %9, %11 : vector<32x32xf32>
    %cst_12 = arith.constant 0.000000e+00 : f32
    %13 = vector.broadcast %cst_12 : f32 to vector<32x32xf32>
    %14 = arith.maximumf %12, %13 : vector<32x32xf32>
    %15 = arith.truncf %14 : vector<32x32xf32> to vector<32x32xbf16>
    %c0_13 = arith.constant 0 : index
    %c0_14 = arith.constant 0 : index
    %16 = vector.load %arg7[%c0_13, %c0_14] : memref<32x32xbf16, #tpu.memory_space<vmem>>, vector<32x32xbf16>
    tpu.vector_store %arg7[%c0_13, %c0_14], %15 {strides = array<i32>} : memref<32x32xbf16, #tpu.memory_space<vmem>>, vector<32x32xbf16>,
    return
  }
  func.func @transform_0(%arg0: i32) -> (i32, i32) {
    %c0_i32 = arith.constant 0 : i32
    %c0_i32_0 = arith.constant 0 : i32
    %c0_i32_1 = arith.constant 0 : i32
    return %c0_i32, %c0_i32_0 : i32, i32
  }
  func.func @transform_1(%arg0: i32) -> (i32, i32) {
    %c0_i32 = arith.constant 0 : i32
    %c0_i32_0 = arith.constant 0 : i32
    return %c0_i32, %arg0 : i32, i32
  }
  func.func @transform_2(%arg0: i32) -> (i32, i32) {
    %c0_i32 = arith.constant 0 : i32
    %c0_i32_0 = arith.constant 0 : i32
    %c0_i32_1 = arith.constant 0 : i32
    return %c0_i32, %c0_i32_0 : i32, i32
  }
  func.func @transform_3(%arg0: i32) -> (i32, i32) {
    %c0_i32 = arith.constant 0 : i32
    %c0_i32_0 = arith.constant 0 : i32
    %c0_i32_1 = arith.constant 0 : i32
    return %c0_i32, %c0_i32_0 : i32, i32
  }
  func.func @transform_4(%arg0: i32) -> (i32, i32) {
    %c0_i32 = arith.constant 0 : i32
    %c0_i32_0 = arith.constant 0 : i32
    return %c0_i32, %arg0 : i32, i32
  }
  func.func @transform_5(%arg0: i32) -> (i32, i32) {
    %c0_i32 = arith.constant 0 : i32
    %c0_i32_0 = arith.constant 0 : i32
    %c0_i32_1 = arith.constant 0 : i32
    return %c0_i32, %c0_i32_0 : i32, i32
  }
  func.func @transform_6(%arg0: i32) -> (i32, i32) {
    %c0_i32 = arith.constant 0 : i32
    %c0_i32_0 = arith.constant 0 : i32
    return %c0_i32, %arg0 : i32, i32
  }
}

module attributes {stable_mosaic.version = 11 : i64} {
  func.func @kernel(%arg0: i32, %arg1: memref<64x288xbf16, #tpu.memory_space<vmem>>, %arg2: memref<288x8xbf16, #tpu.memory_space<vmem>>, %arg3: memref<64x1xf32, #tpu.memory_space<vmem>>, %arg4: memref<64x8xbf16, #tpu.memory_space<vmem>>) attributes {dimension_semantics = [#tpu.dimension_semantics<parallel>], iteration_bounds = array<i64: 1>, scalar_prefetch = 0 : i64, scratch_operands = 0 : i64, tpu.core_type = #tpu.core_type<tc>, window_params = [{pipeline_mode = #tpu.pipeline_mode<synchronous>, transform_indices = @transform_0, window_bounds = array<i64: 64, 288>}, {transform_indices = @transform_1, window_bounds = array<i64: 288, 8>}, {pipeline_mode = #tpu.pipeline_mode<synchronous>, transform_indices = @transform_2, window_bounds = array<i64: 64, 1>}, {transform_indices = @transform_3, window_bounds = array<i64: 64, 8>}]} {
    %c0 = arith.constant 0 : index
    %c0_0 = arith.constant 0 : index
    %0 = vector.load %arg1[%c0, %c0_0] : memref<64x288xbf16, #tpu.memory_space<vmem>>, vector<64x288xbf16>
    %c0_1 = arith.constant 0 : index
    %c0_2 = arith.constant 0 : index
    %1 = vector.load %arg2[%c0_1, %c0_2] : memref<288x8xbf16, #tpu.memory_space<vmem>>, vector<288x8xbf16>
    %cst = arith.constant dense<0.000000e+00> : vector<64x8xf32>
    %2 = tpu.matmul %0, %1, %cst {dimension_numbers = #tpu.dot_dimension_numbers<[1], [0], [0], [1], [0, 0, 1, 1], [], []>} : vector<64x288xbf16>, vector<288x8xbf16>, vector<64x8xf32> -> vector<64x8xf32>
    %c0_3 = arith.constant 0 : index
    %c0_4 = arith.constant 0 : index
    %3 = vector.load %arg3[%c0_3, %c0_4] : memref<64x1xf32, #tpu.memory_space<vmem>>, vector<64x1xf32>
    %4 = vector.broadcast %3 : vector<64x1xf32> to vector<64x8xf32>
    %5 = arith.addf %2, %4 : vector<64x8xf32>
    %cst_5 = arith.constant 0.000000e+00 : f32
    %6 = vector.broadcast %cst_5 : f32 to vector<64x8xf32>
    %7 = arith.maximumf %5, %6 : vector<64x8xf32>
    %8 = arith.truncf %7 : vector<64x8xf32> to vector<64x8xbf16>
    %c0_6 = arith.constant 0 : index
    %c0_7 = arith.constant 0 : index
    %9 = vector.load %arg4[%c0_6, %c0_7] : memref<64x8xbf16, #tpu.memory_space<vmem>>, vector<64x8xbf16>
    tpu.vector_store %arg4[%c0_6, %c0_7], %8 {strides = array<i32>} : memref<64x8xbf16, #tpu.memory_space<vmem>>, vector<64x8xbf16>,
    return
  }
  func.func @transform_0(%arg0: i32) -> (i32, i32) {
    %c0_i32 = arith.constant 0 : i32
    %c0_i32_0 = arith.constant 0 : i32
    %c0_i32_1 = arith.constant 0 : i32
    return %c0_i32, %c0_i32_0 : i32, i32
  }
  func.func @transform_1(%arg0: i32) -> (i32, i32) {
    %c0_i32 = arith.constant 0 : i32
    %c0_i32_0 = arith.constant 0 : i32
    return %c0_i32, %arg0 : i32, i32
  }
  func.func @transform_2(%arg0: i32) -> (i32, i32) {
    %c0_i32 = arith.constant 0 : i32
    %c0_i32_0 = arith.constant 0 : i32
    %c0_i32_1 = arith.constant 0 : i32
    return %c0_i32, %c0_i32_0 : i32, i32
  }
  func.func @transform_3(%arg0: i32) -> (i32, i32) {
    %c0_i32 = arith.constant 0 : i32
    %c0_i32_0 = arith.constant 0 : i32
    return %c0_i32, %arg0 : i32, i32
  }
}

module attributes {stable_mosaic.version = 11 : i64} {
  func.func @kernel(%arg0: i32, %arg1: memref<64x576xbf16, #tpu.memory_space<vmem>>, %arg2: memref<576x8xbf16, #tpu.memory_space<vmem>>, %arg3: memref<64x1xf32, #tpu.memory_space<vmem>>, %arg4: memref<64x32xbf16, #tpu.memory_space<vmem>>, %arg5: memref<32x8xbf16, #tpu.memory_space<vmem>>, %arg6: memref<64x1xf32, #tpu.memory_space<vmem>>, %arg7: memref<8x2xf32, #tpu.memory_space<vmem>>, %arg8: memref<10x64xf32, #tpu.memory_space<vmem>>, %arg9: memref<10x1xf32, #tpu.memory_space<vmem>>, %arg10: memref<10x2xf32, #tpu.memory_space<vmem>>) attributes {dimension_semantics = [#tpu.dimension_semantics<parallel>], iteration_bounds = array<i64: 1>, scalar_prefetch = 0 : i64, scratch_operands = 0 : i64, tpu.core_type = #tpu.core_type<tc>, window_params = [{pipeline_mode = #tpu.pipeline_mode<synchronous>, transform_indices = @transform_0, window_bounds = array<i64: 64, 576>}, {transform_indices = @transform_1, window_bounds = array<i64: 576, 8>}, {pipeline_mode = #tpu.pipeline_mode<synchronous>, transform_indices = @transform_2, window_bounds = array<i64: 64, 1>}, {pipeline_mode = #tpu.pipeline_mode<synchronous>, transform_indices = @transform_3, window_bounds = array<i64: 64, 32>}, {transform_indices = @transform_4, window_bounds = array<i64: 32, 8>}, {pipeline_mode = #tpu.pipeline_mode<synchronous>, transform_indices = @transform_5, window_bounds = array<i64: 64, 1>}, {pipeline_mode = #tpu.pipeline_mode<synchronous>, transform_indices = @transform_6, window_bounds = array<i64: 8, 2>}, {pipeline_mode = #tpu.pipeline_mode<synchronous>, transform_indices = @transform_7, window_bounds = array<i64: 10, 64>}, {pipeline_mode = #tpu.pipeline_mode<synchronous>, transform_indices = @transform_8, window_bounds = array<i64: 10, 1>}, {pipeline_mode = #tpu.pipeline_mode<synchronous>, transform_indices = @transform_9, window_bounds = array<i64: 10, 2>}]} {
    %c0 = arith.constant 0 : index
    %c0_0 = arith.constant 0 : index
    %0 = vector.load %arg1[%c0, %c0_0] : memref<64x576xbf16, #tpu.memory_space<vmem>>, vector<64x576xbf16>
    %c0_1 = arith.constant 0 : index
    %c0_2 = arith.constant 0 : index
    %1 = vector.load %arg2[%c0_1, %c0_2] : memref<576x8xbf16, #tpu.memory_space<vmem>>, vector<576x8xbf16>
    %cst = arith.constant dense<0.000000e+00> : vector<64x8xf32>
    %2 = tpu.matmul %0, %1, %cst {dimension_numbers = #tpu.dot_dimension_numbers<[1], [0], [0], [1], [0, 0, 1, 1], [], []>} : vector<64x576xbf16>, vector<576x8xbf16>, vector<64x8xf32> -> vector<64x8xf32>
    %c0_3 = arith.constant 0 : index
    %c0_4 = arith.constant 0 : index
    %3 = vector.load %arg3[%c0_3, %c0_4] : memref<64x1xf32, #tpu.memory_space<vmem>>, vector<64x1xf32>
    %4 = vector.broadcast %3 : vector<64x1xf32> to vector<64x8xf32>
    %5 = arith.addf %2, %4 : vector<64x8xf32>
    %c0_5 = arith.constant 0 : index
    %c0_6 = arith.constant 0 : index
    %6 = vector.load %arg4[%c0_5, %c0_6] : memref<64x32xbf16, #tpu.memory_space<vmem>>, vector<64x32xbf16>
    %c0_7 = arith.constant 0 : index
    %c0_8 = arith.constant 0 : index
    %7 = vector.load %arg5[%c0_7, %c0_8] : memref<32x8xbf16, #tpu.memory_space<vmem>>, vector<32x8xbf16>
    %cst_9 = arith.constant dense<0.000000e+00> : vector<64x8xf32>
    %8 = tpu.matmul %6, %7, %cst_9 {dimension_numbers = #tpu.dot_dimension_numbers<[1], [0], [0], [1], [0, 0, 1, 1], [], []>} : vector<64x32xbf16>, vector<32x8xbf16>, vector<64x8xf32> -> vector<64x8xf32>
    %9 = arith.addf %5, %8 : vector<64x8xf32>
    %c0_10 = arith.constant 0 : index
    %c0_11 = arith.constant 0 : index
    %10 = vector.load %arg6[%c0_10, %c0_11] : memref<64x1xf32, #tpu.memory_space<vmem>>, vector<64x1xf32>
    %11 = vector.broadcast %10 : vector<64x1xf32> to vector<64x8xf32>
    %12 = arith.addf %9, %11 : vector<64x8xf32>
    %cst_12 = arith.constant 0.000000e+00 : f32
    %13 = vector.broadcast %cst_12 : f32 to vector<64x8xf32>
    %14 = arith.maximumf %12, %13 : vector<64x8xf32>
    %c0_13 = arith.constant 0 : index
    %c0_14 = arith.constant 0 : index
    %15 = vector.load %arg7[%c0_13, %c0_14] : memref<8x2xf32, #tpu.memory_space<vmem>>, vector<8x2xf32>
    %cst_15 = arith.constant dense<0.000000e+00> : vector<64x2xf32>
    %16 = tpu.matmul %14, %15, %cst_15 {dimension_numbers = #tpu.dot_dimension_numbers<[1], [0], [0], [1], [0, 0, 1, 1], [], []>} : vector<64x8xf32>, vector<8x2xf32>, vector<64x2xf32> -> vector<64x2xf32>
    %c0_16 = arith.constant 0 : index
    %c0_17 = arith.constant 0 : index
    %17 = vector.load %arg8[%c0_16, %c0_17] : memref<10x64xf32, #tpu.memory_space<vmem>>, vector<10x64xf32>
    %cst_18 = arith.constant dense<0.000000e+00> : vector<10x2xf32>
    %18 = tpu.matmul %17, %16, %cst_18 {dimension_numbers = #tpu.dot_dimension_numbers<[1], [0], [0], [1], [0, 0, 1, 1], [], []>} : vector<10x64xf32>, vector<64x2xf32>, vector<10x2xf32> -> vector<10x2xf32>
    %c0_19 = arith.constant 0 : index
    %c0_20 = arith.constant 0 : index
    %19 = vector.load %arg9[%c0_19, %c0_20] : memref<10x1xf32, #tpu.memory_space<vmem>>, vector<10x1xf32>
    %20 = vector.broadcast %19 : vector<10x1xf32> to vector<10x2xf32>
    %21 = arith.addf %18, %20 : vector<10x2xf32>
    %c0_21 = arith.constant 0 : index
    %c0_22 = arith.constant 0 : index
    %22 = vector.load %arg10[%c0_21, %c0_22] : memref<10x2xf32, #tpu.memory_space<vmem>>, vector<10x2xf32>
    tpu.vector_store %arg10[%c0_21, %c0_22], %21 {strides = array<i32>} : memref<10x2xf32, #tpu.memory_space<vmem>>, vector<10x2xf32>,
    return
  }
  func.func @transform_0(%arg0: i32) -> (i32, i32) {
    %c0_i32 = arith.constant 0 : i32
    %c0_i32_0 = arith.constant 0 : i32
    %c0_i32_1 = arith.constant 0 : i32
    return %c0_i32, %c0_i32_0 : i32, i32
  }
  func.func @transform_1(%arg0: i32) -> (i32, i32) {
    %c0_i32 = arith.constant 0 : i32
    %c0_i32_0 = arith.constant 0 : i32
    return %c0_i32, %arg0 : i32, i32
  }
  func.func @transform_2(%arg0: i32) -> (i32, i32) {
    %c0_i32 = arith.constant 0 : i32
    %c0_i32_0 = arith.constant 0 : i32
    %c0_i32_1 = arith.constant 0 : i32
    return %c0_i32, %c0_i32_0 : i32, i32
  }
  func.func @transform_3(%arg0: i32) -> (i32, i32) {
    %c0_i32 = arith.constant 0 : i32
    %c0_i32_0 = arith.constant 0 : i32
    %c0_i32_1 = arith.constant 0 : i32
    return %c0_i32, %c0_i32_0 : i32, i32
  }
  func.func @transform_4(%arg0: i32) -> (i32, i32) {
    %c0_i32 = arith.constant 0 : i32
    %c0_i32_0 = arith.constant 0 : i32
    return %c0_i32, %arg0 : i32, i32
  }
  func.func @transform_5(%arg0: i32) -> (i32, i32) {
    %c0_i32 = arith.constant 0 : i32
    %c0_i32_0 = arith.constant 0 : i32
    %c0_i32_1 = arith.constant 0 : i32
    return %c0_i32, %c0_i32_0 : i32, i32
  }
  func.func @transform_6(%arg0: i32) -> (i32, i32) {
    %c0_i32 = arith.constant 0 : i32
    %c0_i32_0 = arith.constant 0 : i32
    %c0_i32_1 = arith.constant 0 : i32
    return %c0_i32, %c0_i32_0 : i32, i32
  }
  func.func @transform_7(%arg0: i32) -> (i32, i32) {
    %c0_i32 = arith.constant 0 : i32
    %c0_i32_0 = arith.constant 0 : i32
    %c0_i32_1 = arith.constant 0 : i32
    return %c0_i32, %c0_i32_0 : i32, i32
  }
  func.func @transform_8(%arg0: i32) -> (i32, i32) {
    %c0_i32 = arith.constant 0 : i32
    %c0_i32_0 = arith.constant 0 : i32
    %c0_i32_1 = arith.constant 0 : i32
    return %c0_i32, %c0_i32_0 : i32, i32
  }
  func.func @transform_9(%arg0: i32) -> (i32, i32) {
    %c0_i32 = arith.constant 0 : i32
    %c0_i32_0 = arith.constant 0 : i32
    %c0_i32_1 = arith.constant 0 : i32
    return %c0_i32, %c0_i32_0 : i32, i32
  }
}

</mosaic_0001>

<bundles_post_ra>
// kernel: resnet_forward.9
= control target key start
LH: loop header
LB: loop body
LE: loop exit
PB: predicated region body
PF: predicated region fallthrough
CT: control target
= control target key end

     0   :  { %s473_s12 = smov 0   ;;  %s475_s13 = smov 0   ;;  %s531_s0 = inlined_call_operand.vmem [shape: bf16[8,36], index: 0, kind: input, shape index: {}]   ;;  %s532_s1 = inlined_call_operand.vmem [shape: bf16[36,512], index: 1, kind: input, shape index: {}]   ;;  %s533_s2 = inlined_call_operand.vmem [shape: f32[8,1], index: 2, kind: input, shape index: {}]   ;;  %s534_s3 = inlined_call_operand.vmem [shape: bf16[8,512], index: 3, kind: output, shape index: {}]  }
   0x1   :  { %s477_s14 = smov 0  }
   0x2 LB: > { %s366_s15 = sadd.s32 4294967295, %s450_s14   ;;  %s490_s16 = sadd.s32 1, %s450_s14   ;;  %s450_s14 = sphi %s477_s14, %s537_s14   ;;  %s446_s13 = sphi %s475_s13, %s536_s13   ;;  %s442_s12 = sphi %s473_s12, %s535_s12  }
   0x3   : > { %s38_s17 = ssub.s32 %s450_s14, %s490_s16  ;;  %s41_s18 = sadd.s32 1, %s446_s13 }
   0x4   : > { %p39_p0 = scmp.eq.s32.totalorder %s38_s17, 0  ;;  %p48_p1 = scmp.ne.s32.totalorder %s446_s13, %s442_s12 }
   0x5   : > { %p49_p2 = scmp.eq.s32.totalorder %s450_s14, 0  ;;  %p369_p4 = scmp.ge.s32.totalorder %s450_s14, 2 }
   0x6   : > { %s499_s19 = scalar_select %p39_p0, %s446_s13, %s41_s18  }
   0x7   : > { %p50_p3 = por %p49_p2, %p48_p1  ;;  %127 = sbr.rel (%p369_p4) target bundleno = 21 (0x15), region = 24 }
   0xc   : > { %130 = sbr.rel (!%p50_p3) target bundleno = 21 (0x15), region = 28  ;;  %s132_s20 = sand.u32 (%p50_p3), 1, %s446_s13  }
   0xd   : > { %s395_s21 = sshll.u32 (%p50_p3), %s450_s14, 3  ;;  %s400_s22 = smul.u32 (%p50_p3), 40, %s132_s20 }
   0xe   : > { %s137_s25 = scalar_lea.vmem (%p50_p3), %s532_s1, %s395_s21 }
   0xf   : > { %v174_v0 = vld [vmem:[%s137_s25] sm:$0xff] (%p50_p3)  ;;  %v176_v1 = vld [vmem:[%s137_s25 + $0x10] sm:$0xff] (%p50_p3)  ;;  %s134_s26 = scalar_lea.vmem (%p50_p3), [#allocation2], %s400_s22 }
  0x10   : > { %v178_v2 = vld [vmem:[%s137_s25 + $0x20] sm:$0xff] (%p50_p3)  ;;  %175 = vst [vmem:[%s134_s26] sm:$0xff] (%p50_p3), %v174_v0  ;;  %v180_v3 = vld [vmem:[%s137_s25 + $0x30] sm:$0xff] (%p50_p3) }
  0x11   : > { %177 = vst [vmem:[%s134_s26 + $0x8] sm:$0xff] %v176_v1  ;;  %v182_v4 = vld [vmem:[%s137_s25 + $0x40] sm:$0xff] }
  0x12   : > { %179 = vst [vmem:[%s134_s26 + $0x10] sm:$0xff] %v178_v2 }
  0x13   : > { %181 = vst [vmem:[%s134_s26 + $0x18] sm:$0xff] %v180_v3 }
  0x14   : > { %183 = vst [vmem:[%s134_s26 + $0x20] sm:$0xff] %v182_v4 }
  0x15 PF: > { %p372_p5 = scmp.ge.s32.totalorder %s450_s14, 1  ;;  %p188_p6 = scmp.lt.s32.totalorder %s450_s14, 3 }
  0x17   : > { %p189_p7 = pnand %p372_p5, %p188_p6 }
  0x18   : > { %s195_s27 = sand.u32 (!%p189_p7), 1, %s442_s12   ;;  %s373_s7 = sshll.u32 (!%p189_p7), %s366_s15, 1 }
  0x19   : > { %192 = sbr.rel (%p189_p7) target bundleno = 182 (0xb6), region = 66  ;;  %p220_p8 = scmp.lt.s32.totalorder (!%p189_p7), %s373_s7, 3 }
  0x1a   : > { %s401_s28 = smul.u32 (!%p189_p7), 40, %s195_s27 }
  0x1c   : > { %s197_s4 = scalar_lea.vmem (!%p189_p7), [#allocation2], %s401_s28 }
  0x1e   : > { %v452_v5 = vmov 0   ;;  %v232_v6 = vld [vmem:[%s533_s2] sm:$0xff]  ;;  %vm267_vm0 = vcmask 1041408   ;;  %v385_v10 = vld [vmem:[%s197_s4 + $0x10] sm:$0xf]  ;;  %vm263_vm1 = vcmask 293888  }
  0x1f   : > { %427 = vset.pattern.permute.xlu0 %v452_v5  ;;  %v231_v7 = vld [vmem:[%s197_s4 + $0x20] sm:$0x33]  ;;  %v399_v13 = vld [vmem:[%s197_s4 + $0x14] sm:$0xf0]  ;;  %v398_v14 = vld [vmem:[%s197_s4 + $0x14] sm:$0xf] }
  0x20   : > { %235 = vperm.xlu0 %427, %v232_v6   ;;  %v251_v8 = vunpack.c.l.b16 %v231_v7  ;;  %v252_v9 = vunpack.c.h.b16 %v231_v7  ;;  %v387_v15 = vld [vmem:[%s197_s4 + $0x18] sm:$0xf0]  ;;  %v386_v18 = vor.u32 %v399_v13, %v385_v10  ;;  %v377_v20 = vld [vmem:[%s197_s4] sm:$0xf]  ;;  %v397_v21 = vld [vmem:[%s197_s4 + $0x4] sm:$0xf0] }
  0x21   : > { %v390_v19 = vor.u32 %v398_v14, %v387_v15  ;;  %v396_v22 = vld [vmem:[%s197_s4 + $0x4] sm:$0xf]  ;;  %v379_v23 = vld [vmem:[%s197_s4 + $0x8] sm:$0xf0]  ;;  %v378_v24 = vor.u32 %v397_v21, %v377_v20  ;;  %v226_v26 = vld [vmem:[%s531_s0] sm:$0xf] }
  0x22   : > { %v257_v11 = vpack.c.b16 %v251_v8, %v251_v8  ;;  %v258_v12 = vpack.c.b16 %v252_v9, %v252_v9  ;;  %v382_v25 = vor.u32 %v396_v22, %v379_v23  ;;  %s539_s7 = smov (!%p220_p8, %s373_s7), 3 }
  0x23   : > { %s374_s8 = sshll.u32 %s539_s7, 2 }
  0x24   : > { %v269_v16 = vsel %vm267_vm0, %v257_v11, 0  ;;  %v272_v17 = vsel %vm267_vm0, %v258_v12, 0  ;;  %s223_s11 = scalar_lea.vmem %s534_s3, %s374_s8 }
  0x25   : > { %279 = vmatpush.bf16.msra.mxu0 %v269_v16  ;;  %292 = vmatpush.bf16.msra.mxu1 %v272_v17 }
  0x29   : > { %280 = vmatpush.bf16.msra.mxu0 %v386_v18  ;;  %293 = vmatpush.bf16.msra.mxu1 %v390_v19 }
  0x2d   : > { %281 = vmatpush.bf16.msra.mxu0 %v378_v24  ;;  %294 = vmatpush.bf16.msra.mxu1 %v382_v25 }
  0x30   : > { %391 = vmatmul.msk.bf16.vlgmr.msra.gmra.mxu0 %vm263_vm1, %v226_v26  ;;  %392 = vmatmul.msk.bf16.vlgmr.msra.gmra.mxu1 %vm263_vm1, %v226_v26 }
  0x92   : > { %v236_v27 = vpop.permute.xlu0 %235 }
  0xad   : > { %v283_v28 = vpop.f32.mrf.mxu0  ;;  %v296_v29 = vpop.f32.mrf.mxu1 }
  0xae   : > { %v284_v30 = vadd.f32 %v283_v28, %v236_v27  ;;  %v297_v31 = vadd.f32 %v296_v29, %v236_v27 }
  0xb0   : > { %v300_v32 = vmax.f32 %v284_v30, 0.0  ;;  %v301_v33 = vmax.f32 %v297_v31, 0.0 }
  0xb2   : > { %v302_v34 = vpack.c.bf16 %v301_v33, %v300_v32 }
  0xb4   : > { %303 = vst [vmem:[%s223_s11] sm:$0xff] %v302_v34 }
  0xb5   : > { %v285_v35 = vpop.f32.mrf.mxu0  ;;  %v298_v36 = vpop.f32.mrf.mxu1 }
  0xb6 PF: > { %p10_p9 = scmp.ge.s32.totalorder %s490_s16, 4   ;;  %s535_s12 = smov %s446_s13 }
  0xb7   : > { %s536_s13 = smov %s499_s19  ;;  %s537_s14 = smov %s490_s16 }
  0xb8   :  { %12 = sbr.rel (!%p10_p9) target bundleno = 2 (0x2), region = 105 }

// kernel: resnet_forward.10
= control target key start
LH: loop header
LB: loop body
LE: loop exit
PB: predicated region body
PF: predicated region fallthrough
CT: control target
= control target key end

     0   :  { %s533_s12 = smov 0   ;;  %s535_s13 = smov 0   ;;  %s610_s0 = inlined_call_operand.vmem [shape: bf16[8,72], index: 0, kind: input, shape index: {}]   ;;  %s611_s1 = inlined_call_operand.vmem [shape: bf16[72,512], index: 1, kind: input, shape index: {}]   ;;  %s612_s2 = inlined_call_operand.vmem [shape: f32[8,1], index: 2, kind: input, shape index: {}]   ;;  %s613_s3 = inlined_call_operand.vmem [shape: bf16[8,512], index: 3, kind: output, shape index: {}]  }
   0x1   :  { %s537_s14 = smov 0  }
   0x2 LB: > { %s406_s15 = sadd.s32 4294967295, %s510_s14   ;;  %s550_s16 = sadd.s32 1, %s510_s14   ;;  %s510_s14 = sphi %s537_s14, %s616_s14   ;;  %s506_s13 = sphi %s535_s13, %s615_s13   ;;  %s502_s12 = sphi %s533_s12, %s614_s12  }
   0x3   : > { %s38_s17 = ssub.s32 %s510_s14, %s550_s16  ;;  %s41_s18 = sadd.s32 1, %s506_s13 }
   0x4   : > { %p39_p0 = scmp.eq.s32.totalorder %s38_s17, 0  ;;  %p48_p1 = scmp.ne.s32.totalorder %s506_s13, %s502_s12 }
   0x5   : > { %p49_p2 = scmp.eq.s32.totalorder %s510_s14, 0  ;;  %p409_p4 = scmp.ge.s32.totalorder %s510_s14, 2 }
   0x6   : > { %s559_s19 = scalar_select %p39_p0, %s506_s13, %s41_s18  }
   0x7   : > { %p50_p3 = por %p49_p2, %p48_p1  ;;  %127 = sbr.rel (%p409_p4) target bundleno = 25 (0x19), region = 24 }
   0xc   : > { %130 = sbr.rel (!%p50_p3) target bundleno = 25 (0x19), region = 28  ;;  %s132_s20 = sand.u32 (%p50_p3), 1, %s506_s13  }
   0xd   : > { %s451_s21 = sshll.u32 (%p50_p3), %s510_s14, 3  ;;  %s460_s22 = smul.u32 (%p50_p3), 72, %s132_s20 }
   0xe   : > { %s137_s25 = scalar_lea.vmem (%p50_p3), %s611_s1, %s451_s21 }
   0xf   : > { %v182_v0 = vld [vmem:[%s137_s25] sm:$0xff] (%p50_p3)  ;;  %v184_v1 = vld [vmem:[%s137_s25 + $0x10] sm:$0xff] (%p50_p3)  ;;  %s134_s26 = scalar_lea.vmem (%p50_p3), [#allocation2], %s460_s22 }
  0x10   : > { %v186_v2 = vld [vmem:[%s137_s25 + $0x20] sm:$0xff] (%p50_p3)  ;;  %183 = vst [vmem:[%s134_s26] sm:$0xff] (%p50_p3), %v182_v0  ;;  %v188_v3 = vld [vmem:[%s137_s25 + $0x30] sm:$0xff] (%p50_p3) }
  0x11   : > { %185 = vst [vmem:[%s134_s26 + $0x8] sm:$0xff] %v184_v1  ;;  %v190_v4 = vld [vmem:[%s137_s25 + $0x40] sm:$0xff]  ;;  %v192_v5 = vld [vmem:[%s137_s25 + $0x50] sm:$0xff] }
  0x12   : > { %187 = vst [vmem:[%s134_s26 + $0x10] sm:$0xff] %v186_v2  ;;  %v194_v6 = vld [vmem:[%s137_s25 + $0x60] sm:$0xff]  ;;  %v196_v7 = vld [vmem:[%s137_s25 + $0x70] sm:$0xff] }
  0x13   : > { %189 = vst [vmem:[%s134_s26 + $0x18] sm:$0xff] %v188_v3  ;;  %v198_v8 = vld [vmem:[%s137_s25 + $0x80] sm:$0xff] }
  0x14   : > { %191 = vst [vmem:[%s134_s26 + $0x20] sm:$0xff] %v190_v4 }
  0x15   : > { %193 = vst [vmem:[%s134_s26 + $0x28] sm:$0xff] %v192_v5 }
  0x16   : > { %195 = vst [vmem:[%s134_s26 + $0x30] sm:$0xff] %v194_v6 }
  0x17   : > { %197 = vst [vmem:[%s134_s26 + $0x38] sm:$0xff] %v196_v7 }
  0x18   : > { %199 = vst [vmem:[%s134_s26 + $0x40] sm:$0xff] %v198_v8 }
  0x19 PF: > { %p412_p5 = scmp.ge.s32.totalorder %s510_s14, 1  ;;  %p204_p6 = scmp.lt.s32.totalorder %s510_s14, 3 }
  0x1b   : > { %p205_p7 = pnand %p412_p5, %p204_p6 }
  0x1c   : > { %s211_s27 = sand.u32 (!%p205_p7), 1, %s502_s12   ;;  %s413_s7 = sshll.u32 (!%p205_p7), %s406_s15, 1 }
  0x1d   : > { %208 = sbr.rel (%p205_p7) target bundleno = 194 (0xc2), region = 66  ;;  %p236_p8 = scmp.lt.s32.totalorder (!%p205_p7), %s413_s7, 3 }
  0x1e   : > { %s461_s28 = smul.u32 (!%p205_p7), 72, %s211_s27 }
  0x20   : > { %s573_s4 = scalar_lea.vmem (!%p205_p7), [#allocation2], %s461_s28 }
  0x22   : > { %v512_v9 = vmov 0   ;;  %v252_v10 = vld [vmem:[%s612_s2] sm:$0xff]  ;;  %vm307_vm0 = vcmask 1043456   ;;  %v441_v14 = vld [vmem:[%s573_s4 + $0x30] sm:$0xf]  ;;  %vm303_vm1 = vcmask 588800  }
  0x23   : > { %487 = vset.pattern.permute.xlu0 %v512_v9  ;;  %v251_v11 = vld [vmem:[%s573_s4 + $0x40] sm:$0xff]  ;;  %v459_v17 = vld [vmem:[%s573_s4 + $0x34] sm:$0xf0]  ;;  %v458_v18 = vld [vmem:[%s573_s4 + $0x34] sm:$0xf]  ;;  %s618_s7 = smov (!%p236_p8, %s413_s7), 3 }
  0x24   : > { %255 = vperm.xlu0 %487, %v252_v10   ;;  %v283_v12 = vunpack.c.l.b16 %v251_v11  ;;  %v284_v13 = vunpack.c.h.b16 %v251_v11  ;;  %v443_v19 = vld [vmem:[%s573_s4 + $0x38] sm:$0xf0]  ;;  %v442_v22 = vor.u32 %v459_v17, %v441_v14  ;;  %v433_v24 = vld [vmem:[%s573_s4 + $0x20] sm:$0xf]  ;;  %v457_v25 = vld [vmem:[%s573_s4 + $0x24] sm:$0xf0] }
  0x25   : > { %v446_v23 = vor.u32 %v458_v18, %v443_v19  ;;  %v456_v26 = vld [vmem:[%s573_s4 + $0x24] sm:$0xf]  ;;  %v435_v27 = vld [vmem:[%s573_s4 + $0x28] sm:$0xf0]  ;;  %v434_v28 = vor.u32 %v457_v25, %v433_v24  ;;  %v425_v30 = vld [vmem:[%s573_s4 + $0x10] sm:$0xf] }
  0x26   : > { %v293_v15 = vpack.c.b16 %v283_v12, %v283_v12  ;;  %v294_v16 = vpack.c.b16 %v284_v13, %v284_v13  ;;  %v438_v29 = vor.u32 %v456_v26, %v435_v27  ;;  %v455_v31 = vld [vmem:[%s573_s4 + $0x14] sm:$0xf0]  ;;  %v454_v32 = vld [vmem:[%s573_s4 + $0x14] sm:$0xf]  ;;  %v427_v33 = vld [vmem:[%s573_s4 + $0x18] sm:$0xf0] }
  0x27   : > { %v426_v34 = vor.u32 %v455_v31, %v425_v30  ;;  %v430_v35 = vor.u32 %v454_v32, %v427_v33  ;;  %v417_v36 = vld [vmem:[%s573_s4] sm:$0xf]  ;;  %v453_v37 = vld [vmem:[%s573_s4 + $0x4] sm:$0xf0]  ;;  %v452_v38 = vld [vmem:[%s573_s4 + $0x4] sm:$0xf] }
  0x28   : > { %v309_v20 = vsel %vm307_vm0, %v293_v15, 0  ;;  %v312_v21 = vsel %vm307_vm0, %v294_v16, 0  ;;  %v419_v39 = vld [vmem:[%s573_s4 + $0x8] sm:$0xf0]  ;;  %v418_v40 = vor.u32 %v453_v37, %v417_v36  ;;  %v242_v42 = vld [vmem:[%s610_s0] sm:$0xf] }
  0x29   : > { %317 = vmatpush.bf16.msra.mxu0 %v309_v20  ;;  %330 = vmatpush.bf16.msra.mxu1 %v312_v21  ;;  %v422_v41 = vor.u32 %v452_v38, %v419_v39  ;;  %s414_s8 = sshll.u32 %s618_s7, 2 }
  0x2a   : > { %s239_s11 = scalar_lea.vmem %s613_s3, %s414_s8 }
  0x2d   : > { %318 = vmatpush.bf16.msra.mxu0 %v442_v22  ;;  %331 = vmatpush.bf16.msra.mxu1 %v446_v23 }
  0x31   : > { %319 = vmatpush.bf16.msra.mxu0 %v434_v28  ;;  %332 = vmatpush.bf16.msra.mxu1 %v438_v29 }
  0x35   : > { %320 = vmatpush.bf16.msra.mxu0 %v426_v34  ;;  %333 = vmatpush.bf16.msra.mxu1 %v430_v35 }
  0x39   : > { %321 = vmatpush.bf16.msra.mxu0 %v418_v40  ;;  %334 = vmatpush.bf16.msra.mxu1 %v422_v41 }
  0x3c   : > { %447 = vmatmul.msk.bf16.vlgmr.msra.gmra.mxu0 %vm303_vm1, %v242_v42  ;;  %448 = vmatmul.msk.bf16.vlgmr.msra.gmra.mxu1 %vm303_vm1, %v242_v42 }
  0x96   : > { %v256_v43 = vpop.permute.xlu0 %255 }
  0xb9   : > { %v323_v44 = vpop.f32.mrf.mxu0  ;;  %v336_v45 = vpop.f32.mrf.mxu1 }
  0xba   : > { %v324_v46 = vadd.f32 %v323_v44, %v256_v43  ;;  %v337_v47 = vadd.f32 %v336_v45, %v256_v43 }
  0xbc   : > { %v340_v48 = vmax.f32 %v324_v46, 0.0  ;;  %v341_v49 = vmax.f32 %v337_v47, 0.0 }
  0xbe   : > { %v342_v50 = vpack.c.bf16 %v341_v49, %v340_v48 }
  0xc0   : > { %343 = vst [vmem:[%s239_s11] sm:$0xff] %v342_v50 }
  0xc1   : > { %v325_v51 = vpop.f32.mrf.mxu0  ;;  %v338_v52 = vpop.f32.mrf.mxu1 }
  0xc2 PF: > { %p10_p9 = scmp.ge.s32.totalorder %s550_s16, 4   ;;  %s614_s12 = smov %s506_s13 }
  0xc3   : > { %s615_s13 = smov %s559_s19  ;;  %s616_s14 = smov %s550_s16 }
  0xc4   :  { %12 = sbr.rel (!%p10_p9) target bundleno = 2 (0x2), region = 105 }

// kernel: resnet_forward.11
= control target key start
LH: loop header
LB: loop body
LE: loop exit
PB: predicated region body
PF: predicated region fallthrough
CT: control target
= control target key end

     0   :  { %s606_s15 = smov 0   ;;  %s608_s16 = smov 0   ;;  %s686_s0 = inlined_call_operand.vmem [shape: bf16[8,72], index: 0, kind: input, shape index: {}]   ;;  %s687_s1 = inlined_call_operand.vmem [shape: bf16[72,512], index: 1, kind: input, shape index: {}]   ;;  %s688_s2 = inlined_call_operand.vmem [shape: f32[8,1], index: 2, kind: input, shape index: {}]   ;;  %s689_s3 = inlined_call_operand.vmem [shape: bf16[8,512], index: 3, kind: input, shape index: {}]   ;;  %s690_s4 = inlined_call_operand.vmem [shape: bf16[8,512], index: 4, kind: output, shape index: {}]  }
   0x1   :  { %s610_s17 = smov 0  }
   0x2 LB: > { %s472_s18 = sadd.s32 4294967295, %s578_s17   ;;  %s623_s19 = sadd.s32 1, %s578_s17   ;;  %s578_s17 = sphi %s610_s17, %s693_s17   ;;  %s574_s16 = sphi %s608_s16, %s692_s16   ;;  %s570_s15 = sphi %s606_s15, %s691_s15  }
   0x3   : > { %s39_s20 = ssub.s32 %s578_s17, %s623_s19  ;;  %s42_s21 = sadd.s32 1, %s574_s16 }
   0x4   : > { %p40_p0 = scmp.eq.s32.totalorder %s39_s20, 0  ;;  %p49_p1 = scmp.ne.s32.totalorder %s574_s16, %s570_s15 }
   0x5   : > { %p50_p2 = scmp.eq.s32.totalorder %s578_s17, 0  ;;  %p475_p4 = scmp.ge.s32.totalorder %s578_s17, 2 }
   0x6   : > { %s632_s22 = scalar_select %p40_p0, %s574_s16, %s42_s21  }
   0x7   : > { %p51_p3 = por %p50_p2, %p49_p1  ;;  %154 = sbr.rel (%p475_p4) target bundleno = 25 (0x19), region = 24 }
   0xc   : > { %157 = sbr.rel (!%p51_p3) target bundleno = 25 (0x19), region = 28  ;;  %s159_s23 = sand.u32 (%p51_p3), 1, %s574_s16  }
   0xd   : > { %s519_s24 = sshll.u32 (%p51_p3), %s578_s17, 3  ;;  %s528_s25 = smul.u32 (%p51_p3), 72, %s159_s23 }
   0xe   : > { %s164_s28 = scalar_lea.vmem (%p51_p3), %s687_s1, %s519_s24 }
   0xf   : > { %v209_v0 = vld [vmem:[%s164_s28] sm:$0xff] (%p51_p3)  ;;  %v211_v1 = vld [vmem:[%s164_s28 + $0x10] sm:$0xff] (%p51_p3)  ;;  %s161_s29 = scalar_lea.vmem (%p51_p3), [#allocation2], %s528_s25 }
  0x10   : > { %v213_v2 = vld [vmem:[%s164_s28 + $0x20] sm:$0xff] (%p51_p3)  ;;  %210 = vst [vmem:[%s161_s29] sm:$0xff] (%p51_p3), %v209_v0  ;;  %v215_v3 = vld [vmem:[%s164_s28 + $0x30] sm:$0xff] (%p51_p3) }
  0x11   : > { %212 = vst [vmem:[%s161_s29 + $0x8] sm:$0xff] %v211_v1  ;;  %v217_v4 = vld [vmem:[%s164_s28 + $0x40] sm:$0xff]  ;;  %v219_v5 = vld [vmem:[%s164_s28 + $0x50] sm:$0xff] }
  0x12   : > { %214 = vst [vmem:[%s161_s29 + $0x10] sm:$0xff] %v213_v2  ;;  %v221_v6 = vld [vmem:[%s164_s28 + $0x60] sm:$0xff]  ;;  %v223_v7 = vld [vmem:[%s164_s28 + $0x70] sm:$0xff] }
  0x13   : > { %216 = vst [vmem:[%s161_s29 + $0x18] sm:$0xff] %v215_v3  ;;  %v225_v8 = vld [vmem:[%s164_s28 + $0x80] sm:$0xff] }
  0x14   : > { %218 = vst [vmem:[%s161_s29 + $0x20] sm:$0xff] %v217_v4 }
  0x15   : > { %220 = vst [vmem:[%s161_s29 + $0x28] sm:$0xff] %v219_v5 }
  0x16   : > { %222 = vst [vmem:[%s161_s29 + $0x30] sm:$0xff] %v221_v6 }
  0x17   : > { %224 = vst [vmem:[%s161_s29 + $0x38] sm:$0xff] %v223_v7 }
  0x18   : > { %226 = vst [vmem:[%s161_s29 + $0x40] sm:$0xff] %v225_v8 }
  0x19 PF: > { %p478_p5 = scmp.ge.s32.totalorder %s578_s17, 1  ;;  %p240_p6 = scmp.lt.s32.totalorder %s578_s17, 3 }
  0x1b   : > { %p241_p7 = pnand %p478_p5, %p240_p6 }
  0x1c   : > { %s247_s30 = sand.u32 (!%p241_p7), 1, %s570_s15   ;;  %s479_s11 = sshll.u32 (!%p241_p7), %s472_s18, 1 }
  0x1d   : > { %244 = sbr.rel (%p241_p7) target bundleno = 195 (0xc3), region = 70  ;;  %p279_p8 = scmp.lt.s32.totalorder (!%p241_p7), %s479_s11, 3 }
  0x1e   : > { %s529_s5 = smul.u32 (!%p241_p7), 72, %s247_s30 }
  0x20   : > { %s646_s8 = scalar_lea.vmem (!%p241_p7), [#allocation2], %s529_s5 }
  0x22   : > { %v580_v9 = vmov 0   ;;  %v301_v10 = vld [vmem:[%s688_s2] sm:$0xff]  ;;  %vm356_vm0 = vcmask 1043456   ;;  %v509_v14 = vld [vmem:[%s646_s8 + $0x30] sm:$0xf]  ;;  %vm352_vm1 = vcmask 588800  }
  0x23   : > { %555 = vset.pattern.permute.xlu0 %v580_v9  ;;  %v300_v11 = vld [vmem:[%s646_s8 + $0x40] sm:$0xff]  ;;  %v527_v17 = vld [vmem:[%s646_s8 + $0x34] sm:$0xf0]  ;;  %v526_v18 = vld [vmem:[%s646_s8 + $0x34] sm:$0xf]  ;;  %s695_s11 = smov (!%p279_p8, %s479_s11), 3 }
  0x24   : > { %304 = vperm.xlu0 %555, %v301_v10   ;;  %v332_v12 = vunpack.c.l.b16 %v300_v11  ;;  %v333_v13 = vunpack.c.h.b16 %v300_v11  ;;  %v511_v19 = vld [vmem:[%s646_s8 + $0x38] sm:$0xf0]  ;;  %v510_v22 = vor.u32 %v527_v17, %v509_v14  ;;  %v501_v24 = vld [vmem:[%s646_s8 + $0x20] sm:$0xf]  ;;  %v525_v25 = vld [vmem:[%s646_s8 + $0x24] sm:$0xf0] }
  0x25   : > { %v514_v23 = vor.u32 %v526_v18, %v511_v19  ;;  %v524_v26 = vld [vmem:[%s646_s8 + $0x24] sm:$0xf]  ;;  %v503_v27 = vld [vmem:[%s646_s8 + $0x28] sm:$0xf0]  ;;  %v502_v28 = vor.u32 %v525_v25, %v501_v24  ;;  %v493_v30 = vld [vmem:[%s646_s8 + $0x10] sm:$0xf] }
  0x26   : > { %v342_v15 = vpack.c.b16 %v332_v12, %v332_v12  ;;  %v343_v16 = vpack.c.b16 %v333_v13, %v333_v13  ;;  %v506_v29 = vor.u32 %v524_v26, %v503_v27  ;;  %v523_v31 = vld [vmem:[%s646_s8 + $0x14] sm:$0xf0]  ;;  %v522_v32 = vld [vmem:[%s646_s8 + $0x14] sm:$0xf]  ;;  %v495_v33 = vld [vmem:[%s646_s8 + $0x18] sm:$0xf0] }
  0x27   : > { %v494_v34 = vor.u32 %v523_v31, %v493_v30  ;;  %v498_v35 = vor.u32 %v522_v32, %v495_v33  ;;  %v485_v36 = vld [vmem:[%s646_s8] sm:$0xf]  ;;  %v521_v37 = vld [vmem:[%s646_s8 + $0x4] sm:$0xf0]  ;;  %v520_v38 = vld [vmem:[%s646_s8 + $0x4] sm:$0xf] }
  0x28   : > { %v358_v20 = vsel %vm356_vm0, %v342_v15, 0  ;;  %v361_v21 = vsel %vm356_vm0, %v343_v16, 0  ;;  %v487_v39 = vld [vmem:[%s646_s8 + $0x8] sm:$0xf0]  ;;  %v486_v40 = vor.u32 %v521_v37, %v485_v36  ;;  %v291_v42 = vld [vmem:[%s686_s0] sm:$0xf] }
  0x29   : > { %366 = vmatpush.bf16.msra.mxu0 %v358_v20  ;;  %379 = vmatpush.bf16.msra.mxu1 %v361_v21  ;;  %v490_v41 = vor.u32 %v520_v38, %v487_v39  ;;  %s480_s12 = sshll.u32 %s695_s11, 2 }
  0x2a   : > { %s282_s15 = scalar_lea.vmem %s689_s3, %s480_s12  ;;  %s288_s20 = scalar_lea.vmem %s690_s4, %s480_s12 }
  0x2b   : > { %v389_v43 = vld [vmem:[%s282_s15] sm:$0xff] }
  0x2c   : > { %v390_v45 = vunpack.c.l.bf16 %v389_v43  ;;  %v391_v46 = vunpack.c.h.bf16 %v389_v43 }
  0x2d   : > { %367 = vmatpush.bf16.msra.mxu0 %v510_v22  ;;  %380 = vmatpush.bf16.msra.mxu1 %v514_v23 }
  0x31   : > { %368 = vmatpush.bf16.msra.mxu0 %v502_v28  ;;  %381 = vmatpush.bf16.msra.mxu1 %v506_v29 }
  0x35   : > { %369 = vmatpush.bf16.msra.mxu0 %v494_v34  ;;  %382 = vmatpush.bf16.msra.mxu1 %v498_v35 }
  0x39   : > { %370 = vmatpush.bf16.msra.mxu0 %v486_v40  ;;  %383 = vmatpush.bf16.msra.mxu1 %v490_v41 }
  0x3c   : > { %515 = vmatmul.msk.bf16.vlgmr.msra.gmra.mxu0 %vm352_vm1, %v291_v42  ;;  %516 = vmatmul.msk.bf16.vlgmr.msra.gmra.mxu1 %vm352_vm1, %v291_v42 }
  0x96   : > { %v305_v44 = vpop.permute.xlu0 %304 }
  0xb9   : > { %v372_v47 = vpop.f32.mrf.mxu0  ;;  %v385_v48 = vpop.f32.mrf.mxu1 }
  0xba   : > { %v373_v49 = vadd.f32 %v372_v47, %v305_v44  ;;  %v386_v50 = vadd.f32 %v385_v48, %v305_v44 }
  0xbc   : > { %v392_v51 = vadd.f32 %v390_v45, %v373_v49  ;;  %v393_v52 = vadd.f32 %v391_v46, %v386_v50 }
  0xbe   : > { %v394_v53 = vmax.f32 %v392_v51, 0.0  ;;  %v395_v54 = vmax.f32 %v393_v52, 0.0 }
  0xc0   : > { %v396_v55 = vpack.c.bf16 %v395_v54, %v394_v53 }
  0xc1   : > { %v374_v56 = vpop.f32.mrf.mxu0  ;;  %v387_v57 = vpop.f32.mrf.mxu1 }
  0xc2   : > { %397 = vst [vmem:[%s288_s20] sm:$0xff] %v396_v55 }
  0xc3 PF: > { %p11_p9 = scmp.ge.s32.totalorder %s623_s19, 4   ;;  %s691_s15 = smov %s574_s16 }
  0xc4   : > { %s692_s16 = smov %s632_s22  ;;  %s693_s17 = smov %s623_s19 }
  0xc5   :  { %13 = sbr.rel (!%p11_p9) target bundleno = 2 (0x2), region = 112 }

// kernel: resnet_forward.12
= control target key start
LH: loop header
LB: loop body
LE: loop exit
PB: predicated region body
PF: predicated region fallthrough
CT: control target
= control target key end

     0   :  { %v135_v1 = vmov 0   ;;  %vm74_vm0 = vcmask 1043456   ;;  %vm70_vm1 = vcmask 588800   ;;  %s183_s1 = inlined_call_operand.vmem [shape: bf16[72,128], index: 1, kind: input, shape index: {}]   ;;  %s184_s2 = inlined_call_operand.vmem [shape: f32[16,1], index: 2, kind: input, shape index: {}]   ;;  %s185_s0 = inlined_call_operand.vmem [shape: bf16[16,72], index: 0, kind: input, shape index: {}]   ;;  %s186_s3 = inlined_call_operand.vmem [shape: bf16[16,128], index: 3, kind: output, shape index: {}]  }
   0x1   :  { %v25_v0 = vld [vmem:[%s183_s1 + $0x20] sm:$0xf]  ;;  %134 = vset.pattern.permute.xlu0 %v135_v1  ;;  %v127_v6 = vld [vmem:[%s183_s1 + $0x18] sm:$0xff]  ;;  %v27_v7 = vld [vmem:[%s184_s2 + $0x8] sm:$0xff] }
   0x2   :  { %v60_v2 = vunpack.c.l.b16 %v25_v0  ;;  %v26_v3 = vld [vmem:[%s184_s2] sm:$0xff]  ;;  %v126_v8 = vld [vmem:[%s183_s1 + $0x10] sm:$0xff]  ;;  %v125_v9 = vld [vmem:[%s183_s1 + $0x8] sm:$0xff] }
   0x3   :  { %30 = vperm.xlu0 %134, %v26_v3   ;;  %v124_v10 = vld [vmem:[%s183_s1] sm:$0xff] }
   0x4   :  { %v65_v4 = vpack.c.b16 %v60_v2, %v60_v2  ;;  %v123_v11 = vld [vmem:[%s185_s0] sm:$0xff] }
   0x6   :  { %v76_v5 = vsel %vm74_vm0, %v65_v4, 0 }
   0x7   :  { %81 = vmatpush.bf16.msra.mxu0 %v76_v5 }
   0xb   :  { %82 = vmatpush.bf16.msra.mxu0 %v127_v6  ;;  %35 = vperm.xlu0 %134, %v27_v7  }
   0xf   :  { %83 = vmatpush.bf16.msra.mxu0 %v126_v8 }
  0x13   :  { %84 = vmatpush.bf16.msra.mxu0 %v125_v9 }
  0x17   :  { %85 = vmatpush.bf16.msra.mxu0 %v124_v10 }
  0x1a   :  { %122 = vmatmul.msk.bf16.vlgmr.msra.gmra.mxu0 %vm70_vm1, %v123_v11 }
  0x75   :  { %v31_v12 = vpop.permute.xlu0 %30 }
  0x7d   :  { %v36_v15 = vpop.permute.xlu0 %35 }
  0x97   :  { %v87_v13 = vpop.f32.mrf.mxu0 }
  0x98   :  { %v88_v14 = vadd.f32 %v87_v13, %v31_v12 }
  0x9a   :  { %v92_v18 = vmax.f32 %v88_v14, 0.0 }
  0x9f   :  { %v89_v16 = vpop.f32.mrf.mxu0 }
  0xa0   :  { %v90_v17 = vadd.f32 %v89_v16, %v36_v15 }
  0xa2   :  { %v93_v19 = vmax.f32 %v90_v17, 0.0 }
  0xa4   :  { %v131_v20 = vpack.c.bf16 %v93_v19, %v92_v18 }
  0xa6   :  { %132 = vst [vmem:[%s186_s3] sm:$0xff] %v131_v20  }

// kernel: resnet_forward.13
= control target key start
LH: loop header
LB: loop body
LE: loop exit
PB: predicated region body
PF: predicated region fallthrough
CT: control target
= control target key end

     0   :  { %vm163_vm0 = vcmask 1043456   ;;  %v277_v6 = vmov 0   ;;  %vm159_vm1 = vcmask 64512   ;;  %vm119_vm2 = vcmask 130048   ;;  %s373_s1 = inlined_call_operand.vmem [shape: bf16[144,128], index: 1, kind: input, shape index: {}]   ;;  %s374_s4 = inlined_call_operand.vmem [shape: bf16[8,128], index: 4, kind: input, shape index: {}]   ;;  %s375_s3 = inlined_call_operand.vmem [shape: bf16[16,8], index: 3, kind: input, shape index: {}]   ;;  %s376_s0 = inlined_call_operand.vmem [shape: bf16[16,144], index: 0, kind: input, shape index: {}]   ;;  %s377_s2 = inlined_call_operand.vmem [shape: f32[16,1], index: 2, kind: input, shape index: {}]   ;;  %s378_s5 = inlined_call_operand.vmem [shape: f32[16,1], index: 5, kind: input, shape index: {}]   ;;  %s379_s6 = inlined_call_operand.vmem [shape: bf16[16,128], index: 6, kind: output, shape index: {}]  }
   0x1   :  { %v266_v0 = vld [vmem:[%s373_s1 + $0x38] sm:$0xff]  ;;  %v153_v1 = vld [vmem:[%s374_s4] sm:$0xf]  ;;  %v265_v2 = vld [vmem:[%s373_s1 + $0x30] sm:$0xff]  ;;  %275 = vset.pattern.permute.xlu0 %v277_v6  ;;  %276 = vset.pattern.permute.xlu1 %v277_v6 }
   0x2   :  { %123 = vmatpush.bf16.msra.mxu0 %v266_v0  ;;  %v165_v3 = vsel %vm163_vm0, %v153_v1, 0  ;;  %v268_v4 = vld [vmem:[%s375_s3] sm:$0xff]  ;;  %v211_v8 = vld [vmem:[%s376_s0 + $0x8] sm:$0xf0]  ;;  %v262_v16 = vld [vmem:[%s373_s1 + $0x18] sm:$0xff] }
   0x3   :  { %v267_v5 = vld [vmem:[%s373_s1 + $0x40] sm:$0xff]  ;;  %174 = vmatpush.bf16.msra.mxu2 %v165_v3  ;;  %v264_v12 = vld [vmem:[%s373_s1 + $0x28] sm:$0xff]  ;;  %v261_v17 = vld [vmem:[%s373_s1 + $0x10] sm:$0xff] }
   0x4   :  { %v257_v7 = vld [vmem:[%s376_s0 + $0x4] sm:$0xf]  ;;  %144 = vmatpush.bf16.msra.mxu1 %v267_v5  ;;  %v45_v14 = vld [vmem:[%s377_s2 + $0x8] sm:$0xff]  ;;  %v209_v20 = vld [vmem:[%s376_s0] sm:$0xf] }
   0x5   :  { %v214_v9 = vor.u32 %v257_v7, %v211_v8  ;;  %v44_v10 = vld [vmem:[%s377_s2] sm:$0xff]  ;;  %v184_v15 = vld [vmem:[%s378_s5 + $0x8] sm:$0xff] }
   0x6   :  { %v183_v11 = vld [vmem:[%s378_s5] sm:$0xff]  ;;  %124 = vmatpush.bf16.msra.mxu0 %v265_v2  ;;  %256 = vmatmul.msk.bf16.vlgmr.msra.gmra.mxu2 %vm159_vm1, %v268_v4  ;;  %v260_v18 = vld [vmem:[%s373_s1 + $0x8] sm:$0xff] }
   0x7   :  { %251 = vmatmul.msk.bf16.vlgmr.msra.gmra.mxu1 %vm119_vm2, %v214_v9  ;;  %48 = vperm.xlu0 %275, %v44_v10   ;;  %v263_v13 = vld [vmem:[%s373_s1 + $0x20] sm:$0xff]  ;;  %v258_v21 = vld [vmem:[%s376_s0 + $0x4] sm:$0xf0] }
   0x8   :  { %187 = vperm.xlu1 %276, %v183_v11   ;;  %v259_v19 = vld [vmem:[%s373_s1] sm:$0xff]  ;;  %v210_v22 = vor.u32 %v258_v21, %v209_v20 }
   0xa   :  { %125 = vmatpush.bf16.msra.mxu0 %v264_v12 }
   0xe   :  { %126 = vmatpush.bf16.msra.mxu0 %v263_v13 }
   0xf   :  { %53 = vperm.xlu0 %275, %v45_v14  }
  0x10   :  { %192 = vperm.xlu1 %276, %v184_v15  }
  0x12   :  { %127 = vmatpush.bf16.msra.mxu0 %v262_v16 }
  0x16   :  { %128 = vmatpush.bf16.msra.mxu0 %v261_v17 }
  0x1a   :  { %129 = vmatpush.bf16.msra.mxu0 %v260_v18 }
  0x1e   :  { %130 = vmatpush.bf16.msra.mxu0 %v259_v19 }
  0x21   :  { %131 = vmatmul.bf16.vlgmr.msra.gmra.mxu0 %v210_v22 }
  0x79   :  { %v49_v23 = vpop.permute.xlu0 %48 }
  0x7a   :  { %v188_v28 = vpop.permute.xlu1 %187 }
  0x81   :  { %v54_v30 = vpop.permute.xlu0 %53 }
  0x82   :  { %v193_v39 = vpop.permute.xlu1 %192 }
  0x84   :  { %v146_v24 = vpop.f32.mrf.mxu1 }
  0x89   :  { %v176_v27 = vpop.f32.mrf.mxu2 }
  0x8c   :  { %v148_v34 = vpop.f32.mrf.mxu1 }
  0x91   :  { %v178_v36 = vpop.f32.mrf.mxu2 }
  0x9e   :  { %v132_v25 = vpop.f32.mrf.mxu0 }
  0x9f   :  { %v133_v26 = vadd.f32 %v132_v25, %v49_v23 }
  0xa1   :  { %v147_v29 = vadd.f32 %v146_v24, %v133_v26 }
  0xa3   :  { %v181_v32 = vadd.f32 %v176_v27, %v147_v29 }
  0xa5   :  { %v195_v37 = vadd.f32 %v188_v28, %v181_v32 }
  0xa6   :  { %v134_v31 = vpop.f32.mrf.mxu0 }
  0xa7   :  { %v135_v33 = vadd.f32 %v134_v31, %v54_v30  ;;  %v197_v41 = vmax.f32 %v195_v37, 0.0 }
  0xa9   :  { %v149_v35 = vadd.f32 %v148_v34, %v135_v33 }
  0xab   :  { %v182_v38 = vadd.f32 %v178_v36, %v149_v35 }
  0xad   :  { %v196_v40 = vadd.f32 %v193_v39, %v182_v38 }
  0xaf   :  { %v198_v42 = vmax.f32 %v196_v40, 0.0 }
  0xb1   :  { %v272_v43 = vpack.c.bf16 %v198_v42, %v197_v41 }
  0xb3   :  { %273 = vst [vmem:[%s379_s6] sm:$0xff] %v272_v43  }

// kernel: resnet_forward.14
= control target key start
LH: loop header
LB: loop body
LE: loop exit
PB: predicated region body
PF: predicated region fallthrough
CT: control target
= control target key end

     0   :  { %v273_v6 = vmov 0   ;;  %vm133_vm0 = vcmask 130048   ;;  %vm186_vm1 = vcmask 257024   ;;  %s375_s1 = inlined_call_operand.vmem [shape: bf16[144,32], index: 1, kind: input, shape index: {}]   ;;  %s376_s0 = inlined_call_operand.vmem [shape: bf16[32,144], index: 0, kind: input, shape index: {}]   ;;  %s377_s2 = inlined_call_operand.vmem [shape: f32[32,1], index: 2, kind: input, shape index: {}]   ;;  %s378_s3 = inlined_call_operand.vmem [shape: bf16[32,32], index: 3, kind: output, shape index: {}]  }
   0x1   :  { %v260_v0 = vld [vmem:[%s375_s1 + $0x38] sm:$0xff]  ;;  %v261_v1 = vld [vmem:[%s375_s1 + $0x40] sm:$0xff]  ;;  %v259_v3 = vld [vmem:[%s375_s1 + $0x30] sm:$0xff]  ;;  %272 = vset.pattern.permute.xlu1 %v273_v6  ;;  %271 = vset.pattern.permute.xlu0 %v273_v6 }
   0x2   :  { %v249_v2 = vld [vmem:[%s376_s0 + $0x4] sm:$0xf]  ;;  %140 = vmatpush.bf16.msra.mxu0 %v260_v0  ;;  %262 = vmatpush.bf16.msra.mxu2 %v260_v0  ;;  %v199_v4 = vld [vmem:[%s376_s0 + $0x8] sm:$0xf0]  ;;  %v39_v7 = vld [vmem:[%s377_s2 + $0x10] sm:$0xff] }
   0x3   :  { %166 = vmatpush.bf16.msra.mxu1 %v261_v1  ;;  %v202_v5 = vor.u32 %v249_v2, %v199_v4  ;;  %v258_v8 = vld [vmem:[%s375_s1 + $0x28] sm:$0xff]  ;;  %v37_v9 = vld [vmem:[%s377_s2] sm:$0xff]  ;;  %53 = vperm.xlu1 %272, %v39_v7   ;;  %v40_v11 = vld [vmem:[%s377_s2 + $0x18] sm:$0xff] }
   0x4   :  { %43 = vperm.xlu0 %271, %v37_v9   ;;  %v257_v10 = vld [vmem:[%s375_s1 + $0x20] sm:$0xff]  ;;  %v38_v12 = vld [vmem:[%s377_s2 + $0x8] sm:$0xff]  ;;  %v256_v13 = vld [vmem:[%s375_s1 + $0x18] sm:$0xff] }
   0x5   :  { %v251_v14 = vld [vmem:[%s376_s0 + $0x14] sm:$0xf]  ;;  %v207_v15 = vld [vmem:[%s376_s0 + $0x18] sm:$0xf0]  ;;  %v254_v18 = vld [vmem:[%s375_s1 + $0x8] sm:$0xff] }
   0x6   :  { %141 = vmatpush.bf16.msra.mxu0 %v259_v3  ;;  %263 = vmatpush.bf16.msra.mxu2 %v259_v3  ;;  %v255_v16 = vld [vmem:[%s375_s1 + $0x10] sm:$0xff]  ;;  %v210_v17 = vor.u32 %v251_v14, %v207_v15  ;;  %v253_v19 = vld [vmem:[%s375_s1] sm:$0xff]  ;;  %v250_v21 = vld [vmem:[%s376_s0 + $0x4] sm:$0xf0] }
   0x7   :  { %247 = vmatmul.msk.bf16.vlgmr.msra.gmra.mxu1 %vm133_vm0, %v202_v5  ;;  %v197_v20 = vld [vmem:[%s376_s0] sm:$0xf]  ;;  %v205_v22 = vld [vmem:[%s376_s0 + $0x10] sm:$0xf]  ;;  %v252_v23 = vld [vmem:[%s376_s0 + $0x14] sm:$0xf0] }
   0x8   :  { %v198_v24 = vor.u32 %v250_v21, %v197_v20  ;;  %v206_v25 = vor.u32 %v252_v23, %v205_v22 }
   0xa   :  { %142 = vmatpush.bf16.msra.mxu0 %v258_v8  ;;  %264 = vmatpush.bf16.msra.mxu2 %v258_v8 }
   0xb   :  { %58 = vperm.xlu1 %272, %v40_v11  }
   0xc   :  { %48 = vperm.xlu0 %271, %v38_v12  }
   0xe   :  { %143 = vmatpush.bf16.msra.mxu0 %v257_v10  ;;  %265 = vmatpush.bf16.msra.mxu2 %v257_v10 }
  0x12   :  { %144 = vmatpush.bf16.msra.mxu0 %v256_v13  ;;  %266 = vmatpush.bf16.msra.mxu2 %v256_v13 }
  0x16   :  { %145 = vmatpush.bf16.msra.mxu0 %v255_v16  ;;  %267 = vmatpush.bf16.msra.mxu2 %v255_v16 }
  0x17   :  { %248 = vmatmul.msk.bf16.gmra.mxu1 %vm133_vm0, %v210_v17 }
  0x1a   :  { %146 = vmatpush.bf16.msra.mxu0 %v254_v18  ;;  %268 = vmatpush.bf16.msra.mxu2 %v254_v18 }
  0x1e   :  { %147 = vmatpush.bf16.msra.mxu0 %v253_v19  ;;  %269 = vmatpush.bf16.msra.mxu2 %v253_v19 }
  0x21   :  { %148 = vmatmul.bf16.vlgmr.msra.gmra.mxu0 %v198_v24  ;;  %153 = vmatmul.bf16.vlgmr.msra.gmra.mxu2 %v206_v25 }
  0x75   :  { %v54_v32 = vpop.permute.xlu1 %53 }
  0x76   :  { %v44_v28 = vpop.permute.xlu0 %43 }
  0x7d   :  { %v59_v46 = vpop.permute.xlu1 %58 }
  0x7e   :  { %v49_v38 = vpop.permute.xlu0 %48 }
  0x84   :  { %v168_v26 = vpop.f32.mrf.mxu1 }
  0x8c   :  { %v170_v27 = vpop.f32.mrf.mxu1 }
  0x94   :  { %v173_v34 = vpop.f32.mrf.mxu1 }
  0x9c   :  { %v175_v50 = vpop.f32.mrf.mxu1 }
  0x9e   :  { %v149_v29 = vpop.f32.mrf.mxu0 }
  0x9f   :  { %v150_v30 = vadd.f32 %v149_v29, %v44_v28 }
  0xa1   :  { %v169_v31 = vadd.f32 %v168_v26, %v150_v30 }
  0xa3   :  { %v178_v33 = vmax.f32 %v169_v31, 0.0 }
  0xa4   :  { %v154_v35 = vpop.f32.mrf.mxu2 }
  0xa5   :  { %v182_v36 = vpack.c.bf16 %v178_v33, %v178_v33  ;;  %v155_v37 = vadd.f32 %v154_v35, %v54_v32 }
  0xa6   :  { %v151_v39 = vpop.f32.mrf.mxu0 }
  0xa7   :  { %187 = vst.msk [vmem:[%s378_s3] sm:$0xf] %vm186_vm1, %v182_v36  ;;  %v174_v40 = vadd.f32 %v173_v34, %v155_v37  ;;  %v152_v41 = vadd.f32 %v151_v39, %v49_v38 }
  0xa9   :  { %v180_v42 = vmax.f32 %v174_v40, 0.0  ;;  %v171_v43 = vadd.f32 %v170_v27, %v152_v41 }
  0xab   :  { %v184_v44 = vpack.c.bf16 %v180_v42, %v180_v42  ;;  %v179_v45 = vmax.f32 %v171_v43, 0.0 }
  0xac   :  { %v156_v47 = vpop.f32.mrf.mxu2 }
  0xad   :  { %189 = vst.msk [vmem:[%s378_s3 + $0x8] sm:$0xf] %vm186_vm1, %v184_v44  ;;  %v183_v48 = vpack.c.bf16 %v179_v45, %v179_v45  ;;  %v157_v49 = vadd.f32 %v156_v47, %v59_v46 }
  0xaf   :  { %188 = vst.msk [vmem:[%s378_s3 + $0x4] sm:$0xf] %vm186_vm1, %v183_v48  ;;  %v176_v51 = vadd.f32 %v175_v50, %v157_v49 }
  0xb1   :  { %v181_v52 = vmax.f32 %v176_v51, 0.0 }
  0xb3   :  { %v185_v53 = vpack.c.bf16 %v181_v52, %v181_v52 }
  0xb5   :  { %190 = vst.msk [vmem:[%s378_s3 + $0xc] sm:$0xf] %vm186_vm1, %v185_v53 }

// kernel: resnet_forward.15
= control target key start
LH: loop header
LB: loop body
LE: loop exit
PB: predicated region body
PF: predicated region fallthrough
CT: control target
= control target key end

     0   :  { %v534_v5 = vmov 0   ;;  %vm230_vm0 = vcmask 261120   ;;  %vm316_vm1 = vcmask 130048   ;;  %vm382_vm2 = vcmask 257024   ;;  %s713_s1 = inlined_call_operand.vmem [shape: bf16[288,32], index: 1, kind: input, shape index: {}]   ;;  %s714_s4 = inlined_call_operand.vmem [shape: bf16[16,32], index: 4, kind: input, shape index: {}]   ;;  %s715_s0 = inlined_call_operand.vmem [shape: bf16[32,288], index: 0, kind: input, shape index: {}]   ;;  %s716_s3 = inlined_call_operand.vmem [shape: bf16[32,16], index: 3, kind: input, shape index: {}]   ;;  %s717_s2 = inlined_call_operand.vmem [shape: f32[32,1], index: 2, kind: input, shape index: {}]   ;;  %s718_s5 = inlined_call_operand.vmem [shape: f32[32,1], index: 5, kind: input, shape index: {}]   ;;  %s719_s6 = inlined_call_operand.vmem [shape: bf16[32,32], index: 6, kind: output, shape index: {}]  }
   0x1   :  { %v516_v0 = vld [vmem:[%s713_s1 + $0x38] sm:$0xff]  ;;  %v515_v2 = vld [vmem:[%s713_s1 + $0x30] sm:$0xff]  ;;  %v526_v4 = vld [vmem:[%s713_s1 + $0x88] sm:$0xff]  ;;  %532 = vset.pattern.permute.xlu1 %v534_v5  ;;  %531 = vset.pattern.permute.xlu0 %v534_v5 }
   0x2   :  { %v524_v1 = vld [vmem:[%s713_s1 + $0x78] sm:$0xff]  ;;  %237 = vmatpush.bf16.msra.mxu0 %v516_v0  ;;  %v523_v3 = vld [vmem:[%s713_s1 + $0x70] sm:$0xff]  ;;  %281 = vmatpush.bf16.msra.mxu2 %v526_v4  ;;  %v525_v6 = vld [vmem:[%s713_s1 + $0x80] sm:$0xff] }
   0x3   :  { %256 = vmatpush.bf16.msra.mxu1 %v524_v1  ;;  %v529_v7 = vld [vmem:[%s714_s4] sm:$0xff]  ;;  %533 = vset.pattern.permute.xlu2 %v534_v5  ;;  %v401_v8 = vld [vmem:[%s715_s0 + $0x8] sm:$0xf]  ;;  %v505_v9 = vld [vmem:[%s715_s0 + $0x10] sm:$0xf0] }
   0x4   :  { %v514_v10 = vld [vmem:[%s713_s1 + $0x28] sm:$0xff]  ;;  %330 = vmatpush.bf16.msra.mxu3 %v529_v7  ;;  %v402_v12 = vor.u32 %v505_v9, %v401_v8  ;;  %v527_v13 = vld [vmem:[%s716_s3] sm:$0xff]  ;;  %v70_v14 = vld [vmem:[%s717_s2 + $0x10] sm:$0xff] }
   0x5   :  { %v522_v11 = vld [vmem:[%s713_s1 + $0x68] sm:$0xff]  ;;  %v513_v15 = vld [vmem:[%s713_s1 + $0x20] sm:$0xff]  ;;  %84 = vperm.xlu1 %532, %v70_v14   ;;  %v512_v18 = vld [vmem:[%s713_s1 + $0x18] sm:$0xff] }
   0x6   :  { %238 = vmatpush.bf16.msra.mxu0 %v515_v2  ;;  %282 = vmatpush.bf16.msra.mxu2 %v525_v6  ;;  %v521_v16 = vld [vmem:[%s713_s1 + $0x60] sm:$0xff]  ;;  %v520_v19 = vld [vmem:[%s713_s1 + $0x58] sm:$0xff]  ;;  %v69_v21 = vld [vmem:[%s717_s2 + $0x8] sm:$0xff] }
   0x7   :  { %257 = vmatpush.bf16.msra.mxu1 %v523_v3  ;;  %v68_v17 = vld [vmem:[%s717_s2] sm:$0xff]  ;;  %501 = vmatmul.msk.bf16.vlgmr.msra.gmra.mxu3 %vm316_vm1, %v527_v13  ;;  %v71_v20 = vld [vmem:[%s717_s2 + $0x18] sm:$0xff]  ;;  %v511_v22 = vld [vmem:[%s713_s1 + $0x10] sm:$0xff] }
   0x8   :  { %74 = vperm.xlu0 %531, %v68_v17   ;;  %v519_v23 = vld [vmem:[%s713_s1 + $0x50] sm:$0xff]  ;;  %v346_v24 = vld [vmem:[%s718_s5] sm:$0xff]  ;;  %v508_v26 = vld [vmem:[%s715_s0 + $0x28] sm:$0xf0] }
   0x9   :  { %487 = vmatmul.msk.bf16.vlgmr.msra.gmra.mxu2 %vm230_vm0, %v402_v12  ;;  %352 = vperm.xlu2 %533, %v346_v24   ;;  %v413_v25 = vld [vmem:[%s715_s0 + $0x20] sm:$0xf]  ;;  %v510_v27 = vld [vmem:[%s713_s1 + $0x8] sm:$0xff]  ;;  %v349_v35 = vld [vmem:[%s718_s5 + $0x18] sm:$0xff] }
   0xa   :  { %239 = vmatpush.bf16.msra.mxu0 %v514_v10  ;;  %v518_v28 = vld [vmem:[%s713_s1 + $0x48] sm:$0xff]  ;;  %v414_v29 = vor.u32 %v508_v26, %v413_v25  ;;  %v509_v31 = vld [vmem:[%s713_s1] sm:$0xff]  ;;  %v348_v36 = vld [vmem:[%s718_s5 + $0x10] sm:$0xff] }
   0xb   :  { %258 = vmatpush.bf16.msra.mxu1 %v522_v11  ;;  %v528_v30 = vld [vmem:[%s716_s3 + $0x8] sm:$0xff]  ;;  %v517_v32 = vld [vmem:[%s713_s1 + $0x40] sm:$0xff]  ;;  %v395_v38 = vld [vmem:[%s715_s0 + $0xc] sm:$0xf0] }
   0xc   :  { %v393_v33 = vld [vmem:[%s715_s0] sm:$0xf]  ;;  %v504_v34 = vld [vmem:[%s715_s0 + $0x8] sm:$0xf0]  ;;  %v503_v37 = vld [vmem:[%s715_s0 + $0x4] sm:$0xf] }
   0xd   :  { %89 = vperm.xlu1 %532, %v71_v20   ;;  %v347_v39 = vld [vmem:[%s718_s5 + $0x8] sm:$0xff]  ;;  %v394_v40 = vor.u32 %v504_v34, %v393_v33  ;;  %v398_v41 = vor.u32 %v503_v37, %v395_v38  ;;  %v405_v42 = vld [vmem:[%s715_s0 + $0x18] sm:$0xf]  ;;  %v507_v43 = vld [vmem:[%s715_s0 + $0x20] sm:$0xf0] }
   0xe   :  { %240 = vmatpush.bf16.msra.mxu0 %v513_v15  ;;  %v506_v44 = vld [vmem:[%s715_s0 + $0x1c] sm:$0xf]  ;;  %v407_v45 = vld [vmem:[%s715_s0 + $0x24] sm:$0xf0]  ;;  %v406_v46 = vor.u32 %v507_v43, %v405_v42 }
   0xf   :  { %259 = vmatpush.bf16.msra.mxu1 %v521_v16  ;;  %v410_v47 = vor.u32 %v506_v44, %v407_v45 }
  0x10   :  { %79 = vperm.xlu0 %531, %v69_v21  }
  0x11   :  { %357 = vperm.xlu2 %533, %v347_v39  }
  0x12   :  { %241 = vmatpush.bf16.msra.mxu0 %v512_v18 }
  0x13   :  { %260 = vmatpush.bf16.msra.mxu1 %v520_v19 }
  0x15   :  { %367 = vperm.xlu1 %532, %v349_v35  }
  0x16   :  { %242 = vmatpush.bf16.msra.mxu0 %v511_v22 }
  0x17   :  { %261 = vmatpush.bf16.msra.mxu1 %v519_v23  ;;  %502 = vmatmul.msk.bf16.gmra.mxu3 %vm316_vm1, %v528_v30 }
  0x18   :  { %362 = vperm.xlu0 %531, %v348_v36  }
  0x19   :  { %488 = vmatmul.msk.bf16.gmra.mxu2 %vm230_vm0, %v414_v29 }
  0x1a   :  { %243 = vmatpush.bf16.msra.mxu0 %v510_v27 }
  0x1b   :  { %262 = vmatpush.bf16.msra.mxu1 %v518_v28 }
  0x1e   :  { %244 = vmatpush.bf16.msra.mxu0 %v509_v31 }
  0x1f   :  { %263 = vmatpush.bf16.msra.mxu1 %v517_v32 }
  0x21   :  { %245 = vmatmul.bf16.vlgmr.msra.gmra.mxu0 %v394_v40 }
  0x22   :  { %264 = vmatmul.bf16.vlgmr.msra.gmra.mxu1 %v398_v41 }
  0x31   :  { %250 = vmatmul.bf16.gmra.mxu0 %v406_v46 }
  0x32   :  { %269 = vmatmul.bf16.gmra.mxu1 %v410_v47 }
  0x63   :  { %v353_v55 = vpop.permute.xlu2 %352 }
  0x6b   :  { %v358_v6 = vpop.permute.xlu2 %357 }
  0x77   :  { %v85_v3 = vpop.permute.xlu1 %84 }
  0x7a   :  { %v75_v48 = vpop.permute.xlu0 %74 }
  0x7f   :  { %v90_v18 = vpop.permute.xlu1 %89 }
  0x82   :  { %v80_v57 = vpop.permute.xlu0 %79 }
  0x87   :  { %v368_v32 = vpop.permute.xlu1 %367 }
  0x8a   :  { %v332_v50 = vpop.f32.mrf.mxu3  ;;  %v363_v20 = vpop.permute.xlu0 %362 }
  0x8c   :  { %v284_v49 = vpop.f32.mrf.mxu2 }
  0x92   :  { %v334_v0 = vpop.f32.mrf.mxu3 }
  0x94   :  { %v286_v58 = vpop.f32.mrf.mxu2 }
  0x9a   :  { %v337_v15 = vpop.f32.mrf.mxu3 }
  0x9c   :  { %v289_v12 = vpop.f32.mrf.mxu2 }
  0x9e   :  { %v246_v51 = vpop.f32.mrf.mxu0 }
  0x9f   :  { %v265_v52 = vpop.f32.mrf.mxu1  ;;  %v247_v53 = vadd.f32 %v246_v51, %v75_v48 }
  0xa1   :  { %v266_v54 = vadd.f32 %v265_v52, %v247_v53 }
  0xa2   :  { %v339_v30 = vpop.f32.mrf.mxu3 }
  0xa3   :  { %v285_v56 = vadd.f32 %v284_v49, %v266_v54 }
  0xa4   :  { %v291_v27 = vpop.f32.mrf.mxu2 }
  0xa5   :  { %v342_v59 = vadd.f32 %v332_v50, %v285_v56 }
  0xa6   :  { %v248_v60 = vpop.f32.mrf.mxu0 }
  0xa7   :  { %v267_v61 = vpop.f32.mrf.mxu1  ;;  %v370_v62 = vadd.f32 %v353_v55, %v342_v59  ;;  %v249_v63 = vadd.f32 %v248_v60, %v80_v57 }
  0xa9   :  { %v374_v1 = vmax.f32 %v370_v62, 0.0  ;;  %v268_v2 = vadd.f32 %v267_v61, %v249_v63 }
  0xab   :  { %v378_v4 = vpack.c.bf16 %v374_v1, %v374_v1  ;;  %v287_v5 = vadd.f32 %v286_v58, %v268_v2 }
  0xad   :  { %383 = vst.msk [vmem:[%s719_s6] sm:$0xf] %vm382_vm2, %v378_v4  ;;  %v343_v7 = vadd.f32 %v334_v0, %v287_v5 }
  0xae   :  { %v251_v8 = vpop.f32.mrf.mxu0 }
  0xaf   :  { %v270_v9 = vpop.f32.mrf.mxu1  ;;  %v371_v10 = vadd.f32 %v358_v6, %v343_v7  ;;  %v252_v11 = vadd.f32 %v251_v8, %v85_v3 }
  0xb1   :  { %v375_v13 = vmax.f32 %v371_v10, 0.0  ;;  %v271_v14 = vadd.f32 %v270_v9, %v252_v11 }
  0xb3   :  { %v379_v16 = vpack.c.bf16 %v375_v13, %v375_v13  ;;  %v290_v17 = vadd.f32 %v289_v12, %v271_v14 }
  0xb5   :  { %384 = vst.msk [vmem:[%s719_s6 + $0x4] sm:$0xf] %vm382_vm2, %v379_v16  ;;  %v344_v19 = vadd.f32 %v337_v15, %v290_v17 }
  0xb6   :  { %v253_v21 = vpop.f32.mrf.mxu0 }
  0xb7   :  { %v372_v22 = vadd.f32 %v363_v20, %v344_v19  ;;  %v254_v23 = vadd.f32 %v253_v21, %v90_v18  ;;  %v272_v24 = vpop.f32.mrf.mxu1 }
  0xb9   :  { %v376_v25 = vmax.f32 %v372_v22, 0.0  ;;  %v273_v26 = vadd.f32 %v272_v24, %v254_v23 }
  0xbb   :  { %v380_v28 = vpack.c.bf16 %v376_v25, %v376_v25  ;;  %v292_v29 = vadd.f32 %v291_v27, %v273_v26 }
  0xbd   :  { %385 = vst.msk [vmem:[%s719_s6 + $0x8] sm:$0xf] %vm382_vm2, %v380_v28  ;;  %v345_v31 = vadd.f32 %v339_v30, %v292_v29 }
  0xbf   :  { %v373_v33 = vadd.f32 %v368_v32, %v345_v31 }
  0xc1   :  { %v377_v34 = vmax.f32 %v373_v33, 0.0 }
  0xc3   :  { %v381_v35 = vpack.c.bf16 %v377_v34, %v377_v34 }
  0xc5   :  { %386 = vst.msk [vmem:[%s719_s6 + $0xc] sm:$0xf] %vm382_vm2, %v381_v35 }

// kernel: resnet_forward.16
= control target key start
LH: loop header
LB: loop body
LE: loop exit
PB: predicated region body
PF: predicated region fallthrough
CT: control target
= control target key end

     0   :  { %vm283_vm0 = vcmask 261120   ;;  %v586_v15 = vmov 0   ;;  %vm399_vm1 = vcmask 60416   ;;  %s813_s1 = inlined_call_operand.vmem [shape: bf16[288,8], index: 1, kind: input, shape index: {}]   ;;  %s814_s0 = inlined_call_operand.vmem [shape: bf16[64,288], index: 0, kind: input, shape index: {}]   ;;  %s815_s2 = inlined_call_operand.vmem [shape: f32[64,1], index: 2, kind: input, shape index: {}]   ;;  %s816_s3 = inlined_call_operand.vmem [shape: bf16[64,8], index: 3, kind: output, shape index: {}]  }
   0x1   :  { %v555_v0 = vld [vmem:[%s813_s1 + $0x38] sm:$0xff]  ;;  %v565_v2 = vld [vmem:[%s813_s1 + $0x88] sm:$0xff]  ;;  %v554_v3 = vld [vmem:[%s813_s1 + $0x30] sm:$0xff]  ;;  %584 = vset.pattern.permute.xlu1 %v586_v15  ;;  %583 = vset.pattern.permute.xlu0 %v586_v15 }
   0x2   :  { %v613_v1 = vld [vmem:[%s813_s1 + $0x78] sm:$0xff]  ;;  %296 = vmatpush.bf16.msra.mxu0 %v555_v0  ;;  %566 = vmatpush.bf16.msra.mxu3 %v555_v0  ;;  %v625_v4 = vld [vmem:[%s813_s1 + $0x70] sm:$0xff]  ;;  %v564_v5 = vld [vmem:[%s813_s1 + $0x80] sm:$0xff] }
   0x3   :  { %574 = vmatpush.bf16.msra.mxu1 %v613_v1  ;;  %360 = vmatpush.bf16.msra.mxu2 %v565_v2  ;;  %v422_v6 = vld [vmem:[%s814_s0 + $0x8] sm:$0xf]  ;;  %v538_v7 = vld [vmem:[%s814_s0 + $0x10] sm:$0xf0]  ;;  %v552_v11 = vld [vmem:[%s813_s1 + $0x20] sm:$0xff] }
   0x4   :  { %v553_v8 = vld [vmem:[%s813_s1 + $0x28] sm:$0xff]  ;;  %v423_v10 = vor.u32 %v538_v7, %v422_v6  ;;  %v653_v12 = vld [vmem:[%s813_s1 + $0x60] sm:$0xff]  ;;  %v551_v13 = vld [vmem:[%s813_s1 + $0x18] sm:$0xff]  ;;  %585 = vset.pattern.permute.xlu2 %v586_v15 }
   0x5   :  { %v643_v9 = vld [vmem:[%s813_s1 + $0x68] sm:$0xff]  ;;  %v662_v14 = vld [vmem:[%s813_s1 + $0x58] sm:$0xff]  ;;  %v550_v16 = vld [vmem:[%s813_s1 + $0x10] sm:$0xff] }
   0x6   :  { %297 = vmatpush.bf16.msra.mxu0 %v554_v3  ;;  %567 = vmatpush.bf16.msra.mxu3 %v554_v3  ;;  %v69_v17 = vld [vmem:[%s815_s2 + $0x10] sm:$0xff]  ;;  %v434_v19 = vld [vmem:[%s814_s0 + $0x20] sm:$0xf]  ;;  %v541_v20 = vld [vmem:[%s814_s0 + $0x28] sm:$0xf0] }
   0x7   :  { %575 = vmatpush.bf16.msra.mxu1 %v625_v4  ;;  %361 = vmatpush.bf16.msra.mxu2 %v564_v5  ;;  %v558_v18 = vld [vmem:[%s813_s1 + $0x50] sm:$0xff]  ;;  %v549_v21 = vld [vmem:[%s813_s1 + $0x8] sm:$0xff]  ;;  %v435_v23 = vor.u32 %v541_v20, %v434_v19  ;;  %v67_v24 = vld [vmem:[%s815_s2] sm:$0xff] }
   0x8   :  { %87 = vperm.xlu1 %584, %v69_v17   ;;  %v557_v22 = vld [vmem:[%s813_s1 + $0x48] sm:$0xff]  ;;  %77 = vperm.xlu0 %583, %v67_v24   ;;  %v548_v25 = vld [vmem:[%s813_s1] sm:$0xff]  ;;  %v426_v26 = vld [vmem:[%s814_s0 + $0x18] sm:$0xf] }
   0x9   :  { %v70_v27 = vld [vmem:[%s815_s2 + $0x18] sm:$0xff]  ;;  %v540_v28 = vld [vmem:[%s814_s0 + $0x20] sm:$0xf0]  ;;  %v414_v29 = vld [vmem:[%s814_s0] sm:$0xf] }
   0xa   :  { %298 = vmatpush.bf16.msra.mxu0 %v553_v8  ;;  %568 = vmatpush.bf16.msra.mxu3 %v553_v8  ;;  %v537_v30 = vld [vmem:[%s814_s0 + $0x8] sm:$0xf0]  ;;  %v556_v31 = vld [vmem:[%s813_s1 + $0x40] sm:$0xff]  ;;  %v539_v32 = vld [vmem:[%s814_s0 + $0x1c] sm:$0xf]  ;;  %v427_v34 = vor.u32 %v540_v28, %v426_v26 }
   0xb   :  { %576 = vmatpush.bf16.msra.mxu1 %v643_v9  ;;  %532 = vmatmul.msk.bf16.vlgmr.msra.gmra.mxu2 %vm283_vm0, %v423_v10  ;;  %v428_v33 = vld [vmem:[%s814_s0 + $0x24] sm:$0xf0]  ;;  %v415_v35 = vor.u32 %v537_v30, %v414_v29  ;;  %v74_v38 = vld [vmem:[%s815_s2 + $0x38] sm:$0xff]  ;;  %v71_v39 = vld [vmem:[%s815_s2 + $0x20] sm:$0xff] }
   0xc   :  { %v431_v36 = vor.u32 %v539_v32, %v428_v33  ;;  %v68_v37 = vld [vmem:[%s815_s2 + $0x8] sm:$0xff]  ;;  %v446_v40 = vld [vmem:[%s814_s0 + $0x38] sm:$0xf]  ;;  %v544_v41 = vld [vmem:[%s814_s0 + $0x40] sm:$0xf0]  ;;  %97 = vperm.xlu2 %585, %v71_v39  }
   0xd   :  { %v447_v42 = vor.u32 %v544_v41, %v446_v40  ;;  %v73_v43 = vld [vmem:[%s815_s2 + $0x30] sm:$0xff]  ;;  %v72_v44 = vld [vmem:[%s815_s2 + $0x28] sm:$0xff]  ;;  %v543_v46 = vld [vmem:[%s814_s0 + $0x38] sm:$0xf0] }
   0xe   :  { %299 = vmatpush.bf16.msra.mxu0 %v552_v11  ;;  %569 = vmatpush.bf16.msra.mxu3 %v552_v11  ;;  %v438_v45 = vld [vmem:[%s814_s0 + $0x30] sm:$0xf]  ;;  %v542_v47 = vld [vmem:[%s814_s0 + $0x34] sm:$0xf]  ;;  %v440_v48 = vld [vmem:[%s814_s0 + $0x3c] sm:$0xf0] }
   0xf   :  { %577 = vmatpush.bf16.msra.mxu1 %v653_v12  ;;  %v439_v49 = vor.u32 %v543_v46, %v438_v45  ;;  %v443_v50 = vor.u32 %v542_v47, %v440_v48  ;;  %v458_v51 = vld [vmem:[%s814_s0 + $0x50] sm:$0xf]  ;;  %v547_v52 = vld [vmem:[%s814_s0 + $0x58] sm:$0xf0]  ;;  %v536_v54 = vld [vmem:[%s814_s0 + $0x4] sm:$0xf] }
  0x10   :  { %92 = vperm.xlu1 %584, %v70_v27   ;;  %82 = vperm.xlu0 %583, %v68_v37   ;;  %v459_v53 = vor.u32 %v547_v52, %v458_v51  ;;  %v416_v55 = vld [vmem:[%s814_s0 + $0xc] sm:$0xf0]  ;;  %v450_v57 = vld [vmem:[%s814_s0 + $0x48] sm:$0xf]  ;;  %v546_v58 = vld [vmem:[%s814_s0 + $0x50] sm:$0xf0] }
  0x11   :  { %v419_v56 = vor.u32 %v536_v54, %v416_v55  ;;  %v545_v59 = vld [vmem:[%s814_s0 + $0x4c] sm:$0xf]  ;;  %v452_v60 = vld [vmem:[%s814_s0 + $0x54] sm:$0xf0]  ;;  %v451_v61 = vor.u32 %v546_v58, %v450_v57 }
  0x12   :  { %300 = vmatpush.bf16.msra.mxu0 %v551_v13  ;;  %570 = vmatpush.bf16.msra.mxu3 %v551_v13  ;;  %v455_v62 = vor.u32 %v545_v59, %v452_v60 }
  0x13   :  { %578 = vmatpush.bf16.msra.mxu1 %v662_v14 }
  0x14   :  { %102 = vperm.xlu2 %585, %v72_v44  }
  0x16   :  { %301 = vmatpush.bf16.msra.mxu0 %v550_v16  ;;  %571 = vmatpush.bf16.msra.mxu3 %v550_v16 }
  0x17   :  { %579 = vmatpush.bf16.msra.mxu1 %v558_v18 }
  0x18   :  { %112 = vperm.xlu1 %584, %v74_v38   ;;  %107 = vperm.xlu0 %583, %v73_v43  }
  0x1a   :  { %302 = vmatpush.bf16.msra.mxu0 %v549_v21  ;;  %572 = vmatpush.bf16.msra.mxu3 %v549_v21 }
  0x1b   :  { %580 = vmatpush.bf16.msra.mxu1 %v557_v22  ;;  %533 = vmatmul.msk.bf16.gmra.mxu2 %vm283_vm0, %v435_v23 }
  0x1e   :  { %303 = vmatpush.bf16.msra.mxu0 %v548_v25  ;;  %573 = vmatpush.bf16.msra.mxu3 %v548_v25 }
  0x1f   :  { %581 = vmatpush.bf16.msra.mxu1 %v556_v31 }
  0x21   :  { %309 = vmatmul.bf16.vlgmr.msra.gmra.mxu3 %v427_v34  ;;  %304 = vmatmul.bf16.vlgmr.msra.gmra.mxu0 %v415_v35 }
  0x22   :  { %325 = vmatpush.bf16.msrb.mxu0 %v613_v1  ;;  %338 = vmatmul.bf16.vlgmr.msra.gmra.mxu1 %v431_v36 }
  0x26   :  { %326 = vmatpush.bf16.msrb.mxu0 %v625_v4 }
  0x2a   :  { %327 = vmatpush.bf16.msrb.mxu0 %v643_v9 }
  0x2b   :  { %534 = vmatmul.msk.bf16.gmra.mxu2 %vm283_vm0, %v447_v42 }
  0x2e   :  { %328 = vmatpush.bf16.msrb.mxu0 %v653_v12 }
  0x31   :  { %314 = vmatmul.bf16.gmra.mxu3 %v439_v49 }
  0x32   :  { %329 = vmatpush.bf16.msrb.mxu0 %v662_v14  ;;  %343 = vmatmul.bf16.gmra.mxu1 %v443_v50 }
  0x36   :  { %330 = vmatpush.bf16.msrb.mxu0 %v558_v18 }
  0x3a   :  { %331 = vmatpush.bf16.msrb.mxu0 %v557_v22 }
  0x3b   :  { %535 = vmatmul.msk.bf16.gmra.mxu2 %vm283_vm0, %v459_v53 }
  0x3e   :  { %332 = vmatpush.bf16.msrb.mxu0 %v556_v31 }
  0x41   :  { %333 = vmatmul.bf16.vlgmr.msrb.gmra.mxu0 %v419_v56  ;;  %319 = vmatmul.bf16.gmra.mxu3 %v451_v61 }
  0x42   :  { %348 = vmatmul.bf16.gmra.mxu1 %v455_v62 }
  0x66   :  { %v98_v19 = vpop.permute.xlu2 %97 }
  0x6e   :  { %v103_v32 = vpop.permute.xlu2 %102 }
  0x7a   :  { %v88_v3 = vpop.permute.xlu1 %87  ;;  %v78_v16 = vpop.permute.xlu0 %77 }
  0x82   :  { %v93_v11 = vpop.permute.xlu1 %92  ;;  %v83_v28 = vpop.permute.xlu0 %82 }
  0x8a   :  { %v108_v46 = vpop.permute.xlu0 %107  ;;  %v113_v61 = vpop.permute.xlu1 %112 }
  0x8e   :  { %v363_v63 = vpop.f32.mrf.mxu2 }
  0x96   :  { %v365_v0 = vpop.f32.mrf.mxu2 }
  0x9e   :  { %v368_v1 = vpop.f32.mrf.mxu2  ;;  %v305_v8 = vpop.f32.mrf.mxu0 }
  0x9f   :  { %v339_v2 = vpop.f32.mrf.mxu1  ;;  %v306_v30 = vadd.f32 %v305_v8, %v78_v16 }
  0xa4   :  { %v310_v4 = vpop.f32.mrf.mxu3 }
  0xa5   :  { %v311_v5 = vadd.f32 %v310_v4, %v88_v3 }
  0xa6   :  { %v370_v9 = vpop.f32.mrf.mxu2  ;;  %v307_v21 = vpop.f32.mrf.mxu0 }
  0xa7   :  { %v340_v6 = vadd.f32 %v339_v2, %v311_v5  ;;  %v341_v7 = vpop.f32.mrf.mxu1  ;;  %v308_v44 = vadd.f32 %v307_v21, %v83_v28 }
  0xa9   :  { %v369_v10 = vadd.f32 %v368_v1, %v340_v6 }
  0xab   :  { %v385_v12 = vmax.f32 %v369_v10, 0.0 }
  0xac   :  { %v312_v13 = vpop.f32.mrf.mxu3 }
  0xad   :  { %v393_v14 = vpack.c.bf16 %v385_v12, %v385_v12  ;;  %v313_v15 = vadd.f32 %v312_v13, %v93_v11 }
  0xae   :  { %v373_v22 = vpop.f32.mrf.mxu2 }
  0xaf   :  { %402 = vst.msk [vmem:[%s816_s3 + $0x8] sm:$0xf] %vm399_vm1, %v393_v14  ;;  %v342_v17 = vadd.f32 %v341_v7, %v313_v15  ;;  %v344_v18 = vpop.f32.mrf.mxu1 }
  0xb1   :  { %v371_v20 = vadd.f32 %v370_v9, %v342_v17 }
  0xb3   :  { %v386_v23 = vmax.f32 %v371_v20, 0.0 }
  0xb4   :  { %v315_v24 = vpop.f32.mrf.mxu3 }
  0xb5   :  { %v394_v25 = vpack.c.bf16 %v386_v23, %v386_v23  ;;  %v316_v26 = vadd.f32 %v315_v24, %v98_v19 }
  0xb6   :  { %v375_v35 = vpop.f32.mrf.mxu2 }
  0xb7   :  { %403 = vst.msk [vmem:[%s816_s3 + $0xc] sm:$0xf] %vm399_vm1, %v394_v25  ;;  %v345_v27 = vadd.f32 %v344_v18, %v316_v26  ;;  %v346_v31 = vpop.f32.mrf.mxu1 }
  0xb9   :  { %v374_v29 = vadd.f32 %v373_v22, %v345_v27 }
  0xbb   :  { %v387_v33 = vmax.f32 %v374_v29, 0.0 }
  0xbc   :  { %v317_v37 = vpop.f32.mrf.mxu3 }
  0xbd   :  { %v395_v38 = vpack.c.bf16 %v387_v33, %v387_v33  ;;  %v318_v39 = vadd.f32 %v317_v37, %v103_v32 }
  0xbe   :  { %v334_v34 = vpop.f32.mrf.mxu0  ;;  %v378_v54 = vpop.f32.mrf.mxu2 }
  0xbf   :  { %v335_v36 = vadd.f32 %v334_v34, %v306_v30  ;;  %404 = vst.msk [vmem:[%s816_s3 + $0x10] sm:$0xf] %vm399_vm1, %v395_v38  ;;  %v347_v41 = vadd.f32 %v346_v31, %v318_v39  ;;  %v349_v49 = vpop.f32.mrf.mxu1 }
  0xc1   :  { %v364_v40 = vadd.f32 %v363_v63, %v335_v36  ;;  %v376_v43 = vadd.f32 %v375_v35, %v347_v41 }
  0xc3   :  { %v383_v42 = vmax.f32 %v364_v40, 0.0  ;;  %v388_v47 = vmax.f32 %v376_v43, 0.0 }
  0xc4   :  { %v320_v51 = vpop.f32.mrf.mxu3 }
  0xc5   :  { %v391_v45 = vpack.c.bf16 %v383_v42, %v383_v42  ;;  %v396_v52 = vpack.c.bf16 %v388_v47, %v388_v47  ;;  %v321_v53 = vadd.f32 %v320_v51, %v108_v46 }
  0xc6   :  { %v336_v48 = vpop.f32.mrf.mxu0  ;;  %v380_v3 = vpop.f32.mrf.mxu2 }
  0xc7   :  { %400 = vst.msk [vmem:[%s816_s3] sm:$0xf] %vm399_vm1, %v391_v45  ;;  %v337_v50 = vadd.f32 %v336_v48, %v308_v44  ;;  %v350_v56 = vadd.f32 %v349_v49, %v321_v53 }
  0xc8   :  { %405 = vst.msk [vmem:[%s816_s3 + $0x14] sm:$0xf] %vm399_vm1, %v396_v52 }
  0xc9   :  { %v366_v55 = vadd.f32 %v365_v0, %v337_v50  ;;  %v379_v58 = vadd.f32 %v378_v54, %v350_v56  ;;  %v351_v0 = vpop.f32.mrf.mxu1 }
  0xcb   :  { %v384_v57 = vmax.f32 %v366_v55, 0.0  ;;  %v389_v60 = vmax.f32 %v379_v58, 0.0 }
  0xcc   :  { %v322_v62 = vpop.f32.mrf.mxu3 }
  0xcd   :  { %v392_v59 = vpack.c.bf16 %v384_v57, %v384_v57  ;;  %v397_v63 = vpack.c.bf16 %v389_v60, %v389_v60  ;;  %v323_v1 = vadd.f32 %v322_v62, %v113_v61 }
  0xcf   :  { %401 = vst.msk [vmem:[%s816_s3 + $0x4] sm:$0xf] %vm399_vm1, %v392_v59  ;;  %v352_v2 = vadd.f32 %v351_v0, %v323_v1 }
  0xd0   :  { %406 = vst.msk [vmem:[%s816_s3 + $0x18] sm:$0xf] %vm399_vm1, %v397_v63 }
  0xd1   :  { %v381_v4 = vadd.f32 %v380_v3, %v352_v2 }
  0xd3   :  { %v390_v5 = vmax.f32 %v381_v4, 0.0 }
  0xd5   :  { %v398_v6 = vpack.c.bf16 %v390_v5, %v390_v5 }
  0xd7   :  { %407 = vst.msk [vmem:[%s816_s3 + $0x1c] sm:$0xf] %vm399_vm1, %v398_v6 }

// kernel: resnet_forward.17
= control target key start
LH: loop header
LB: loop body
LE: loop exit
PB: predicated region body
PF: predicated region fallthrough
CT: control target
= control target key end

     0   :  { %v1259_v8 = vmov 0   ;;  %vm493_vm0 = vcmask 523264   ;;  %vm695_vm1 = vcmask 261120   ;;  %vm810_vm2 = vcmask 64512   ;;  %s1664_s1 = inlined_call_operand.vmem [shape: bf16[576,8], index: 1, kind: input, shape index: {}]   ;;  %s1665_s2 = inlined_call_operand.vmem [shape: f32[64,1], index: 2, kind: input, shape index: {}]   ;;  %s1666_s5 = inlined_call_operand.vmem [shape: f32[64,1], index: 5, kind: input, shape index: {}]   ;;  %s1667_s0 = inlined_call_operand.vmem [shape: bf16[64,576], index: 0, kind: input, shape index: {}]   ;;  %s1668_s4 = inlined_call_operand.vmem [shape: bf16[32,8], index: 4, kind: input, shape index: {}]   ;;  %s1669_s8 = inlined_call_operand.vmem [shape: f32[10,1], index: 8, kind: input, shape index: {}]   ;;  %s1670_s3 = inlined_call_operand.vmem [shape: bf16[64,32], index: 3, kind: input, shape index: {}]   ;;  %s1671_s6 = inlined_call_operand.vmem [shape: f32[8,2], index: 6, kind: input, shape index: {}]   ;;  %s1672_s7 = inlined_call_operand.vmem [shape: f32[10,64], index: 7, kind: input, shape index: {}]   ;;  %s1673_s9 = inlined_call_operand.vmem [shape: f32[10,2], index: 9, kind: output, shape index: {}]  }
   0x1   :  { %v1220_v0 = vld [vmem:[%s1664_s1 + $0x38] sm:$0xff]  ;;  %v1219_v4 = vld [vmem:[%s1664_s1 + $0x30] sm:$0xff]  ;;  %1256 = vset.pattern.permute.xlu0 %v1259_v8  ;;  %1257 = vset.pattern.permute.xlu1 %v1259_v8  ;;  %v1218_v9 = vld [vmem:[%s1664_s1 + $0x28] sm:$0xff]  ;;  %vm919_vm3 = vcmask 15360   ;;  %vm921_vm4 = vcmask 9216  }
   0x2   :  { %v1228_v1 = vld [vmem:[%s1664_s1 + $0x78] sm:$0xff]  ;;  %506 = vmatpush.bf16.msra.mxu0 %v1220_v0  ;;  %v1227_v5 = vld [vmem:[%s1664_s1 + $0x70] sm:$0xff]  ;;  %1258 = vset.pattern.permute.xlu2 %v1259_v8  ;;  %v1226_v10 = vld [vmem:[%s1664_s1 + $0x68] sm:$0xff] }
   0x3   :  { %v1236_v2 = vld [vmem:[%s1664_s1 + $0xb8] sm:$0xff]  ;;  %535 = vmatpush.bf16.msra.mxu1 %v1228_v1  ;;  %v1235_v6 = vld [vmem:[%s1664_s1 + $0xb0] sm:$0xff]  ;;  %v1234_v11 = vld [vmem:[%s1664_s1 + $0xa8] sm:$0xff] }
   0x4   :  { %v1244_v3 = vld [vmem:[%s1664_s1 + $0xf8] sm:$0xff]  ;;  %564 = vmatpush.bf16.msra.mxu2 %v1236_v2  ;;  %v1243_v7 = vld [vmem:[%s1664_s1 + $0xf0] sm:$0xff]  ;;  %v1242_v12 = vld [vmem:[%s1664_s1 + $0xe8] sm:$0xff] }
   0x5   :  { %593 = vmatpush.bf16.msra.mxu3 %v1244_v3  ;;  %v1217_v13 = vld [vmem:[%s1664_s1 + $0x20] sm:$0xff]  ;;  %v1216_v18 = vld [vmem:[%s1664_s1 + $0x18] sm:$0xff]  ;;  %v1215_v22 = vld [vmem:[%s1664_s1 + $0x10] sm:$0xff] }
   0x6   :  { %507 = vmatpush.bf16.msra.mxu0 %v1219_v4  ;;  %v1225_v14 = vld [vmem:[%s1664_s1 + $0x60] sm:$0xff]  ;;  %v1224_v19 = vld [vmem:[%s1664_s1 + $0x58] sm:$0xff]  ;;  %v1223_v23 = vld [vmem:[%s1664_s1 + $0x50] sm:$0xff] }
   0x7   :  { %536 = vmatpush.bf16.msra.mxu1 %v1227_v5  ;;  %v1233_v15 = vld [vmem:[%s1664_s1 + $0xa0] sm:$0xff]  ;;  %v1232_v20 = vld [vmem:[%s1664_s1 + $0x98] sm:$0xff]  ;;  %v1231_v25 = vld [vmem:[%s1664_s1 + $0x90] sm:$0xff] }
   0x8   :  { %565 = vmatpush.bf16.msra.mxu2 %v1235_v6  ;;  %v1241_v16 = vld [vmem:[%s1664_s1 + $0xe0] sm:$0xff]  ;;  %v1240_v21 = vld [vmem:[%s1664_s1 + $0xd8] sm:$0xff]  ;;  %v1239_v26 = vld [vmem:[%s1664_s1 + $0xd0] sm:$0xff] }
   0x9   :  { %594 = vmatpush.bf16.msra.mxu3 %v1243_v7  ;;  %v129_v17 = vld [vmem:[%s1665_s2] sm:$0xff]  ;;  %v130_v27 = vld [vmem:[%s1665_s2 + $0x8] sm:$0xff]  ;;  %v1195_v37 = vld [vmem:[%s1667_s0 + $0x10] sm:$0xf0] }
   0xa   :  { %508 = vmatpush.bf16.msra.mxu0 %v1218_v9  ;;  %139 = vperm.xlu0 %1256, %v129_v17   ;;  %v745_v24 = vld [vmem:[%s1666_s5] sm:$0xff]  ;;  %v1214_v28 = vld [vmem:[%s1664_s1 + $0x8] sm:$0xff]  ;;  %v131_v38 = vld [vmem:[%s1665_s2 + $0x10] sm:$0xff] }
   0xb   :  { %537 = vmatpush.bf16.msra.mxu1 %v1226_v10  ;;  %755 = vperm.xlu1 %1257, %v745_v24   ;;  %v1222_v29 = vld [vmem:[%s1664_s1 + $0x48] sm:$0xff]  ;;  %v1213_v32 = vld [vmem:[%s1664_s1] sm:$0xff]  ;;  %v931_v40 = vld [vmem:[%s1667_s0 + $0x14] sm:$0xf0] }
   0xc   :  { %566 = vmatpush.bf16.msra.mxu2 %v1234_v11  ;;  %v1230_v30 = vld [vmem:[%s1664_s1 + $0x88] sm:$0xff]  ;;  %v1221_v33 = vld [vmem:[%s1664_s1 + $0x40] sm:$0xff]  ;;  %v1196_v42 = vld [vmem:[%s1667_s0 + $0x18] sm:$0xf0] }
   0xd   :  { %595 = vmatpush.bf16.msra.mxu3 %v1242_v12  ;;  %v1238_v31 = vld [vmem:[%s1664_s1 + $0xc8] sm:$0xff]  ;;  %v1229_v34 = vld [vmem:[%s1664_s1 + $0x80] sm:$0xff]  ;;  %v747_v50 = vld [vmem:[%s1666_s5 + $0x10] sm:$0xff] }
   0xe   :  { %509 = vmatpush.bf16.msra.mxu0 %v1217_v13  ;;  %v1237_v35 = vld [vmem:[%s1664_s1 + $0xc0] sm:$0xff]  ;;  %v937_v41 = vld [vmem:[%s1667_s0 + $0x8] sm:$0xf]  ;;  %v1194_v43 = vld [vmem:[%s1667_s0 + $0xc] sm:$0xf] }
   0xf   :  { %538 = vmatpush.bf16.msra.mxu1 %v1225_v14  ;;  %v929_v36 = vld [vmem:[%s1667_s0] sm:$0xf]  ;;  %v1193_v39 = vld [vmem:[%s1667_s0 + $0x4] sm:$0xf]  ;;  %v938_v47 = vor.u32 %v1196_v42, %v937_v41  ;;  %v949_v51 = vld [vmem:[%s1667_s0 + $0x28] sm:$0xf] }
  0x10   :  { %567 = vmatpush.bf16.msra.mxu2 %v1233_v15  ;;  %v939_v44 = vld [vmem:[%s1667_s0 + $0x1c] sm:$0xf0]  ;;  %v930_v45 = vor.u32 %v1195_v37, %v929_v36  ;;  %v934_v46 = vor.u32 %v1193_v39, %v931_v40  ;;  %v1200_v52 = vld [vmem:[%s1667_s0 + $0x38] sm:$0xf0]  ;;  %v1198_v53 = vld [vmem:[%s1667_s0 + $0x2c] sm:$0xf] }
  0x11   :  { %596 = vmatpush.bf16.msra.mxu3 %v1241_v16  ;;  %v942_v48 = vor.u32 %v1194_v43, %v939_v44  ;;  %v133_v49 = vld [vmem:[%s1665_s2 + $0x20] sm:$0xff]  ;;  %v957_v55 = vld [vmem:[%s1667_s0 + $0x30] sm:$0xf]  ;;  %v1199_v57 = vld [vmem:[%s1667_s0 + $0x34] sm:$0xf]  ;;  %v950_v59 = vor.u32 %v1200_v52, %v949_v51 }
  0x12   :  { %510 = vmatpush.bf16.msra.mxu0 %v1216_v18  ;;  %144 = vperm.xlu0 %1256, %v130_v27   ;;  %v951_v54 = vld [vmem:[%s1667_s0 + $0x3c] sm:$0xf0]  ;;  %v1201_v56 = vld [vmem:[%s1667_s0 + $0x40] sm:$0xf0]  ;;  %v959_v58 = vld [vmem:[%s1667_s0 + $0x44] sm:$0xf0] }
  0x13   :  { %539 = vmatpush.bf16.msra.mxu1 %v1224_v19  ;;  %149 = vperm.xlu1 %1257, %v131_v38   ;;  %v954_v60 = vor.u32 %v1198_v53, %v951_v54  ;;  %v958_v61 = vor.u32 %v1201_v56, %v957_v55  ;;  %v962_v62 = vor.u32 %v1199_v57, %v959_v58  ;;  %v1248_v63 = vld [vmem:[%s1664_s1 + $0x118] sm:$0xff]  ;;  %v746_v0 = vld [vmem:[%s1666_s5 + $0x8] sm:$0xff]  ;;  %v1247_v3 = vld [vmem:[%s1664_s1 + $0x110] sm:$0xff] }
  0x14   :  { %568 = vmatpush.bf16.msra.mxu2 %v1232_v20  ;;  %v134_v1 = vld [vmem:[%s1665_s2 + $0x28] sm:$0xff]  ;;  %760 = vperm.xlu2 %1258, %v746_v0   ;;  %v749_v4 = vld [vmem:[%s1666_s5 + $0x20] sm:$0xff]  ;;  %v969_v7 = vld [vmem:[%s1667_s0 + $0x50] sm:$0xf] }
  0x15   :  { %597 = vmatpush.bf16.msra.mxu3 %v1240_v21  ;;  %v1254_v2 = vld [vmem:[%s1668_s4 + $0x8] sm:$0xff]  ;;  %v1253_v5 = vld [vmem:[%s1668_s4] sm:$0xff]  ;;  %v132_v8 = vld [vmem:[%s1665_s2 + $0x18] sm:$0xff] }
  0x16   :  { %511 = vmatpush.bf16.msra.mxu0 %v1215_v22  ;;  %v1246_v6 = vld [vmem:[%s1664_s1 + $0x108] sm:$0xff]  ;;  %v1205_v9 = vld [vmem:[%s1667_s0 + $0x60] sm:$0xf0]  ;;  %v1203_v10 = vld [vmem:[%s1667_s0 + $0x54] sm:$0xf] }
  0x17   :  { %540 = vmatpush.bf16.msra.mxu1 %v1223_v23  ;;  %v750_v11 = vld [vmem:[%s1666_s5 + $0x28] sm:$0xff]  ;;  %v977_v13 = vld [vmem:[%s1667_s0 + $0x58] sm:$0xf]  ;;  %v1204_v15 = vld [vmem:[%s1667_s0 + $0x5c] sm:$0xf]  ;;  %v970_v18 = vor.u32 %v1205_v9, %v969_v7 }
  0x18   :  { %569 = vmatpush.bf16.msra.mxu2 %v1231_v25  ;;  %v971_v12 = vld [vmem:[%s1667_s0 + $0x64] sm:$0xf0]  ;;  %v1206_v14 = vld [vmem:[%s1667_s0 + $0x68] sm:$0xf0]  ;;  %v979_v16 = vld [vmem:[%s1667_s0 + $0x6c] sm:$0xf0] }
  0x19   :  { %598 = vmatpush.bf16.msra.mxu3 %v1239_v26  ;;  %v1245_v17 = vld [vmem:[%s1664_s1 + $0x100] sm:$0xff]  ;;  %v974_v19 = vor.u32 %v1203_v10, %v971_v12  ;;  %v978_v20 = vor.u32 %v1206_v14, %v977_v13  ;;  %v982_v21 = vor.u32 %v1204_v15, %v979_v16  ;;  %v136_v22 = vld [vmem:[%s1665_s2 + $0x38] sm:$0xff]  ;;  %v1210_v27 = vld [vmem:[%s1667_s0 + $0x88] sm:$0xf0] }
  0x1a   :  { %512 = vmatpush.bf16.msra.mxu0 %v1214_v28  ;;  %765 = vperm.xlu0 %1256, %v747_v50   ;;  %v752_v23 = vld [vmem:[%s1666_s5 + $0x38] sm:$0xff]  ;;  %v878_v25 = vld [vmem:[%s1669_s8] sm:$0xff]  ;;  %v135_v38 = vld [vmem:[%s1665_s2 + $0x30] sm:$0xff] }
  0x1b   :  { %541 = vmatpush.bf16.msra.mxu1 %v1222_v29  ;;  %159 = vperm.xlu1 %1257, %v133_v49   ;;  %v748_v24 = vld [vmem:[%s1666_s5 + $0x18] sm:$0xff]  ;;  %v991_v29 = vld [vmem:[%s1667_s0 + $0x8c] sm:$0xf0]  ;;  %v1197_v40 = vld [vmem:[%s1667_s0 + $0x20] sm:$0xf0] }
  0x1c   :  { %570 = vmatpush.bf16.msra.mxu2 %v1230_v30  ;;  %154 = vperm.xlu2 %1258, %v132_v8   ;;  %v989_v26 = vld [vmem:[%s1667_s0 + $0x78] sm:$0xf]  ;;  %v1208_v28 = vld [vmem:[%s1667_s0 + $0x7c] sm:$0xf]  ;;  %v997_v30 = vld [vmem:[%s1667_s0 + $0x80] sm:$0xf] }
  0x1d   :  { %599 = vmatpush.bf16.msra.mxu3 %v1238_v31  ;;  %v1211_v31 = vld [vmem:[%s1667_s0 + $0x90] sm:$0xf0]  ;;  %v945_v39 = vld [vmem:[%s1667_s0 + $0x10] sm:$0xf]  ;;  %v1249_v42 = vld [vmem:[%s1670_s3] sm:$0xff] }
  0x1e   :  { %513 = vmatpush.bf16.msra.mxu0 %v1213_v32  ;;  %v1209_v32 = vld [vmem:[%s1667_s0 + $0x84] sm:$0xf]  ;;  %v998_v36 = vor.u32 %v1211_v31, %v997_v30  ;;  %v946_v41 = vor.u32 %v1197_v40, %v945_v39  ;;  %v751_v43 = vld [vmem:[%s1666_s5 + $0x30] sm:$0xff]  ;;  %v879_v44 = vld [vmem:[%s1669_s8 + $0x8] sm:$0x3] }
  0x1f   :  { %542 = vmatpush.bf16.msra.mxu1 %v1221_v33  ;;  %v999_v33 = vld [vmem:[%s1667_s0 + $0x94] sm:$0xf0]  ;;  %v985_v49 = vld [vmem:[%s1667_s0 + $0x60] sm:$0xf]  ;;  %v1207_v50 = vld [vmem:[%s1667_s0 + $0x70] sm:$0xf0] }
  0x20   :  { %571 = vmatpush.bf16.msra.mxu2 %v1229_v34  ;;  %v990_v34 = vor.u32 %v1210_v27, %v989_v26  ;;  %v1002_v37 = vor.u32 %v1209_v32, %v999_v33  ;;  %v986_v51 = vor.u32 %v1207_v50, %v985_v49  ;;  %v1251_v52 = vld [vmem:[%s1670_s3 + $0x10] sm:$0xff]  ;;  %v1005_v53 = vld [vmem:[%s1667_s0 + $0x88] sm:$0xf]  ;;  %v1212_v54 = vld [vmem:[%s1667_s0 + $0x98] sm:$0xf0] }
  0x21   :  { %600 = vmatpush.bf16.msra.mxu3 %v1237_v35  ;;  %514 = vmatmul.bf16.vlgmr.msra.gmra.mxu0 %v930_v45  ;;  %v994_v35 = vor.u32 %v1208_v28, %v991_v29  ;;  %v965_v45 = vld [vmem:[%s1667_s0 + $0x38] sm:$0xf]  ;;  %v1006_v55 = vor.u32 %v1212_v54, %v1005_v53 }
  0x22   :  { %543 = vmatmul.bf16.vlgmr.msra.gmra.mxu1 %v934_v46  ;;  %626 = vmatpush.bf16.msrb.mxu0 %v1248_v63  ;;  %v1202_v46 = vld [vmem:[%s1667_s0 + $0x48] sm:$0xf0]  ;;  %v1252_v56 = vld [vmem:[%s1670_s3 + $0x18] sm:$0xff] }
  0x23   :  { %572 = vmatmul.bf16.vlgmr.msra.gmra.mxu2 %v938_v47  ;;  %164 = vperm.xlu0 %1256, %v134_v1   ;;  %v966_v47 = vor.u32 %v1202_v46, %v965_v45  ;;  %v809_v1 = vld [vmem:[%s1671_s6] sm:$0xff] }
  0x24   :  { %601 = vmatmul.bf16.vlgmr.msra.gmra.mxu3 %v942_v48  ;;  %714 = vmatpush.bf16.msrb.mxu1 %v1254_v2  ;;  %v1250_v48 = vld [vmem:[%s1670_s3 + $0x8] sm:$0xff] }
  0x25   :  { %775 = vperm.xlu1 %1257, %v749_v4   ;;  %770 = vperm.xlu2 %1258, %v748_v24  }
  0x26   :  { %627 = vmatpush.bf16.msrb.mxu0 %v1247_v3  ;;  %850 = vmatpush.msrb.mxu2 %v809_v1 }
  0x28   :  { %715 = vmatpush.bf16.msrb.mxu1 %v1253_v5 }
  0x2a   :  { %628 = vmatpush.bf16.msrb.mxu0 %v1246_v6 }
  0x2b   :  { %780 = vperm.xlu0 %1256, %v750_v11  }
  0x2d   :  { %174 = vperm.xlu1 %1257, %v136_v22   ;;  %169 = vperm.xlu2 %1258, %v135_v38  }
  0x2e   :  { %629 = vmatpush.bf16.msrb.mxu0 %v1245_v17 }
  0x31   :  { %519 = vmatmul.bf16.gmra.mxu0 %v950_v59 }
  0x32   :  { %548 = vmatmul.bf16.gmra.mxu1 %v954_v60 }
  0x33   :  { %577 = vmatmul.bf16.gmra.mxu2 %v958_v61  ;;  %790 = vperm.xlu0 %1256, %v752_v23  }
  0x34   :  { %606 = vmatmul.bf16.gmra.mxu3 %v962_v62 }
  0x35   :  { %882 = vperm.xlu1 %1257, %v878_v25   ;;  %785 = vperm.xlu2 %1258, %v751_v43  }
  0x3d   :  { %887 = vperm.xlu2 %1258, %v879_v44  }
  0x41   :  { %524 = vmatmul.bf16.gmra.mxu0 %v970_v18 }
  0x42   :  { %553 = vmatmul.bf16.gmra.mxu1 %v974_v19 }
  0x43   :  { %582 = vmatmul.bf16.gmra.mxu2 %v978_v20 }
  0x44   :  { %611 = vmatmul.bf16.gmra.mxu3 %v982_v21 }
  0x51   :  { %529 = vmatmul.bf16.gmra.mxu0 %v990_v34 }
  0x52   :  { %558 = vmatmul.bf16.gmra.mxu1 %v994_v35 }
  0x53   :  { %587 = vmatmul.bf16.gmra.mxu2 %v998_v36 }
  0x54   :  { %616 = vmatmul.bf16.gmra.mxu3 %v1002_v37 }
  0x61   :  { %1151 = vmatmul.msk.bf16.vlgmr.msrb.gmra.mxu0 %vm493_vm0, %v946_v41 }
  0x62   :  { %1179 = vmatmul.msk.bf16.vlgmr.msrb.gmra.mxu1 %vm695_vm1, %v1249_v42 }
  0x6e   :  { %v761_v23 = vpop.permute.xlu2 %760 }
  0x71   :  { %1152 = vmatmul.msk.bf16.gmra.mxu0 %vm493_vm0, %v966_v47 }
  0x72   :  { %1180 = vmatmul.msk.bf16.gmra.mxu1 %vm695_vm1, %v1250_v48 }
  0x76   :  { %v155_v41 = vpop.permute.xlu2 %154 }
  0x7c   :  { %v140_v8 = vpop.permute.xlu0 %139 }
  0x7d   :  { %v756_v13 = vpop.permute.xlu1 %755 }
  0x81   :  { %1153 = vmatmul.msk.bf16.gmra.mxu0 %vm493_vm0, %v986_v51 }
  0x82   :  { %1181 = vmatmul.msk.bf16.gmra.mxu1 %vm695_vm1, %v1251_v52 }
  0x84   :  { %v145_v18 = vpop.permute.xlu0 %144 }
  0x85   :  { %v150_v29 = vpop.permute.xlu1 %149 }
  0x8c   :  { %v766_v48 = vpop.permute.xlu0 %765 }
  0x91   :  { %1154 = vmatmul.msk.bf16.gmra.mxu0 %vm493_vm0, %v1006_v55  ;;  %v160_v55 = vpop.permute.xlu1 %159 }
  0x92   :  { %1182 = vmatmul.msk.bf16.gmra.mxu1 %vm695_vm1, %v1252_v56 }
  0x9e   :  { %v515_v57 = vpop.f32.mrf.mxu0 }
  0x9f   :  { %v544_v58 = vpop.f32.mrf.mxu1  ;;  %v516_v12 = vadd.f32 %v515_v57, %v140_v8 }
  0xa1   :  { %v545_v17 = vadd.f32 %v544_v58, %v516_v12 }
  0xa6   :  { %v517_v59 = vpop.f32.mrf.mxu0  ;;  %v573_v6 = vpop.f32.mrf.mxu2 }
  0xa7   :  { %v546_v60 = vpop.f32.mrf.mxu1  ;;  %v602_v7 = vpop.f32.mrf.mxu3  ;;  %v574_v19 = vadd.f32 %v573_v6, %v545_v17  ;;  %v518_v20 = vadd.f32 %v517_v59, %v145_v18 }
  0xa8   :  { %v776_v18 = vpop.permute.xlu1 %775 }
  0xa9   :  { %v603_v22 = vadd.f32 %v602_v7, %v574_v19  ;;  %v547_v26 = vadd.f32 %v546_v60, %v518_v20 }
  0xae   :  { %v520_v61 = vpop.f32.mrf.mxu0  ;;  %v575_v11 = vpop.f32.mrf.mxu2 }
  0xaf   :  { %v549_v62 = vpop.f32.mrf.mxu1  ;;  %v604_v14 = vpop.f32.mrf.mxu3  ;;  %v576_v30 = vadd.f32 %v575_v11, %v547_v26  ;;  %v521_v32 = vadd.f32 %v520_v61, %v150_v29 }
  0xb1   :  { %v605_v34 = vadd.f32 %v604_v14, %v576_v30  ;;  %v550_v39 = vadd.f32 %v549_v62, %v521_v32  ;;  %v771_v62 = vpop.permute.xlu2 %770 }
  0xb6   :  { %v522_v63 = vpop.f32.mrf.mxu0  ;;  %v578_v21 = vpop.f32.mrf.mxu2 }
  0xb7   :  { %v551_v0 = vpop.f32.mrf.mxu1  ;;  %v607_v27 = vpop.f32.mrf.mxu3  ;;  %v579_v42 = vadd.f32 %v578_v21, %v550_v39  ;;  %v523_v45 = vadd.f32 %v522_v63, %v155_v41 }
  0xb9   :  { %v608_v47 = vadd.f32 %v607_v27, %v579_v42  ;;  %v552_v52 = vadd.f32 %v551_v0, %v523_v45  ;;  %v165_v0 = vpop.permute.xlu0 %164 }
  0xbe   :  { %v525_v2 = vpop.f32.mrf.mxu0  ;;  %v580_v35 = vpop.f32.mrf.mxu2 }
  0xbf   :  { %v1621_v3 = vpop.f32.mrf.mxu1  ;;  %v609_v43 = vpop.f32.mrf.mxu3  ;;  %v581_v56 = vadd.f32 %v580_v35, %v552_v52  ;;  %v526_v58 = vadd.f32 %v525_v2, %v160_v55 }
  0xc1   :  { %v610_v61 = vadd.f32 %v609_v43, %v581_v56  ;;  %v555_v7 = vadd.f32 %v1621_v3, %v526_v58  ;;  %v170_v3 = vpop.permute.xlu2 %169 }
  0xc6   :  { %v1623_v4 = vpop.f32.mrf.mxu0  ;;  %v583_v53 = vpop.f32.mrf.mxu2 }
  0xc7   :  { %v1625_v5 = vpop.f32.mrf.mxu1  ;;  %v612_v59 = vpop.f32.mrf.mxu3  ;;  %v584_v11 = vadd.f32 %v583_v53, %v555_v7  ;;  %v528_v14 = vadd.f32 %v1623_v4, %v165_v0  ;;  %v876_v7 = vld [vmem:[%s1672_s7] sm:$0xff] }
  0xc9   :  { %v613_v2 = vadd.f32 %v612_v59, %v584_v11 }
  0xce   :  { %v1627_v9 = vpop.f32.mrf.mxu0  ;;  %v585_v12 = vpop.f32.mrf.mxu2 }
  0xcf   :  { %v1629_v10 = vpop.f32.mrf.mxu1  ;;  %v614_v19 = vpop.f32.mrf.mxu3  ;;  %v531_v27 = vadd.f32 %v1627_v9, %v170_v3 }
  0xd6   :  { %v1631_v15 = vpop.f32.mrf.mxu0 }
  0xd7   :  { %v1633_v16 = vpop.f32.mrf.mxu1  ;;  %v617_v35 = vpop.f32.mrf.mxu3 }
  0xde   :  { %v631_v24 = vpop.f32.mrf.mxu0 }
  0xdf   :  { %v717_v25 = vpop.f32.mrf.mxu1  ;;  %v632_v28 = vadd.f32 %v631_v24, %v603_v22 }
  0xe1   :  { %v737_v31 = vadd.f32 %v717_v25, %v632_v28  ;;  %v588_v28 = vpop.f32.mrf.mxu2 }
  0xe3   :  { %v793_v33 = vadd.f32 %v756_v13, %v737_v31 }
  0xe5   :  { %v801_v36 = vmax.f32 %v793_v33, 0.0  ;;  %v560_v33 = vadd.f32 %v1629_v10, %v531_v27 }
  0xe6   :  { %v633_v37 = vpop.f32.mrf.mxu0 }
  0xe7   :  { %v719_v38 = vpop.f32.mrf.mxu1  ;;  %v634_v40 = vadd.f32 %v633_v37, %v605_v34  ;;  %1183 = vmatmul.msk.f32.vlgmr.msrb.gmra.mxu2 %vm810_vm2, %v801_v36  ;;  %v589_v36 = vadd.f32 %v588_v28, %v560_v33 }
  0xe9   :  { %v738_v44 = vadd.f32 %v719_v38, %v634_v40  ;;  %v781_v38 = vpop.permute.xlu0 %780  ;;  %v618_v9 = vadd.f32 %v617_v35, %v589_v36  ;;  %v590_v41 = vpop.f32.mrf.mxu2 }
  0xeb   :  { %v794_v46 = vadd.f32 %v761_v23, %v738_v44  ;;  %v557_v23 = vadd.f32 %v1625_v5, %v528_v14  ;;  %v175_v5 = vpop.permute.xlu1 %174 }
  0xec   :  { %v533_v39 = vadd.f32 %v1631_v15, %v175_v5 }
  0xed   :  { %v802_v49 = vmax.f32 %v794_v46, 0.0  ;;  %v586_v25 = vadd.f32 %v585_v12, %v557_v23 }
  0xee   :  { %v636_v50 = vpop.f32.mrf.mxu0  ;;  %v562_v45 = vadd.f32 %v1633_v16, %v533_v39 }
  0xef   :  { %v722_v51 = vpop.f32.mrf.mxu1  ;;  %v637_v54 = vadd.f32 %v636_v50, %v608_v47  ;;  %1184 = vmatmul.msk.f32.gmra.mxu2 %vm810_vm2, %v802_v49  ;;  %v615_v4 = vadd.f32 %v614_v19, %v586_v25  ;;  %v619_v49 = vpop.f32.mrf.mxu3 }
  0xf0   :  { %v591_v10 = vadd.f32 %v590_v41, %v562_v45 }
  0xf1   :  { %v739_v57 = vadd.f32 %v722_v51, %v637_v54  ;;  %v791_v56 = vpop.permute.xlu0 %790 }
  0xf2   :  { %v620_v51 = vadd.f32 %v619_v49, %v591_v10 }
  0xf3   :  { %v795_v60 = vadd.f32 %v766_v48, %v739_v57  ;;  %v786_v48 = vpop.permute.xlu2 %785  ;;  %v883_v0 = vpop.permute.xlu1 %882 }
  0xf5   :  { %v803_v63 = vmax.f32 %v795_v60, 0.0 }
  0xf6   :  { %v638_v1 = vpop.f32.mrf.mxu0 }
  0xf7   :  { %v724_v6 = vpop.f32.mrf.mxu1  ;;  %v639_v8 = vadd.f32 %v638_v1, %v610_v61  ;;  %1185 = vmatmul.msk.f32.gmra.mxu2 %vm810_vm2, %v803_v63 }
  0xf9   :  { %v740_v13 = vadd.f32 %v724_v6, %v639_v8  ;;  %v877_v8 = vld [vmem:[%s1672_s7 + $0x8] sm:$0x3] }
  0xfb   :  { %v796_v17 = vadd.f32 %v771_v62, %v740_v13  ;;  %v888_v13 = vpop.permute.xlu2 %887 }
  0xfd   :  { %v804_v20 = vmax.f32 %v796_v17, 0.0 }
  0xfe   :  { %v641_v21 = vpop.f32.mrf.mxu0 }
  0xff   :  { %v727_v22 = vpop.f32.mrf.mxu1  ;;  %v642_v24 = vadd.f32 %v641_v21, %v613_v2  ;;  %1186 = vmatmul.msk.f32.gmra.mxu2 %vm810_vm2, %v804_v20 }
 0x101   :  { %v741_v26 = vadd.f32 %v727_v22, %v642_v24 }
 0x103   :  { %v797_v29 = vadd.f32 %v776_v18, %v741_v26 }
 0x105   :  { %v805_v30 = vmax.f32 %v797_v29, 0.0 }
 0x106   :  { %v643_v31 = vpop.f32.mrf.mxu0 }
 0x107   :  { %v729_v32 = vpop.f32.mrf.mxu1  ;;  %v644_v34 = vadd.f32 %v643_v31, %v615_v4  ;;  %1187 = vmatmul.msk.f32.gmra.mxu2 %vm810_vm2, %v805_v30 }
 0x109   :  { %v742_v37 = vadd.f32 %v729_v32, %v644_v34 }
 0x10b   :  { %v798_v40 = vadd.f32 %v781_v38, %v742_v37 }
 0x10d   :  { %v806_v42 = vmax.f32 %v798_v40, 0.0 }
 0x10e   :  { %v646_v43 = vpop.f32.mrf.mxu0 }
 0x10f   :  { %v732_v44 = vpop.f32.mrf.mxu1  ;;  %v647_v46 = vadd.f32 %v646_v43, %v618_v9  ;;  %1188 = vmatmul.msk.f32.gmra.mxu2 %vm810_vm2, %v806_v42 }
 0x111   :  { %v743_v47 = vadd.f32 %v732_v44, %v647_v46 }
 0x113   :  { %v799_v50 = vadd.f32 %v786_v48, %v743_v47 }
 0x115   :  { %v807_v52 = vmax.f32 %v799_v50, 0.0 }
 0x116   :  { %v648_v53 = vpop.f32.mrf.mxu0 }
 0x117   :  { %v649_v15 = vadd.f32 %v648_v53, %v620_v51  ;;  %1189 = vmatmul.msk.f32.gmra.mxu2 %vm810_vm2, %v807_v52  ;;  %v734_v54 = vpop.f32.mrf.mxu1 }
 0x119   :  { %v744_v55 = vadd.f32 %v734_v54, %v649_v15 }
 0x11b   :  { %v800_v57 = vadd.f32 %v791_v56, %v744_v55 }
 0x11d   :  { %v808_v58 = vmax.f32 %v800_v57, 0.0 }
 0x11f   :  { %1190 = vmatmul.msk.f32.gmra.mxu2 %vm810_vm2, %v808_v58 }
 0x16a   :  { %v852_v16 = vpop.f32.mrf.mxu2 }
 0x172   :  { %v855_v59 = vpop.f32.mrf.mxu2 }
 0x17a   :  { %v858_v60 = vpop.f32.mrf.mxu2 }
 0x182   :  { %v861_v61 = vpop.f32.mrf.mxu2 }
 0x18a   :  { %v864_v62 = vpop.f32.mrf.mxu2 }
 0x192   :  { %v867_v63 = vpop.f32.mrf.mxu2 }
 0x19a   :  { %v870_v1 = vpop.f32.mrf.mxu2 }
 0x1a2   :  { %v873_v6 = vpop.f32.mrf.mxu2 }
 0x1a3   :  { %904 = vmatpush.msrb.mxu3 %v873_v6 }
 0x1a5   :  { %905 = vmatpush.msrb.mxu3 %v870_v1 }
 0x1a7   :  { %906 = vmatpush.msrb.mxu3 %v867_v63 }
 0x1a9   :  { %907 = vmatpush.msrb.mxu3 %v864_v62 }
 0x1ab   :  { %908 = vmatpush.msrb.mxu3 %v861_v61 }
 0x1ad   :  { %909 = vmatpush.msrb.mxu3 %v858_v60 }
 0x1af   :  { %910 = vmatpush.msrb.mxu3 %v855_v59 }
 0x1b1   :  { %911 = vmatpush.msrb.mxu3 %v852_v16 }
 0x1b2   :  { %1191 = vmatmul.msk.f32.vlgmr.msrb.gmra.mxu3 %vm493_vm0, %v876_v7 }
 0x1ba   :  { %1192 = vmatmul.msk.f32.gmra.mxu3 %vm493_vm0, %v877_v8 }
 0x235   :  { %v913_v11 = vpop.f32.mrf.mxu3 }
 0x236   :  { %v914_v12 = vadd.f32 %v913_v11, %v883_v0 }
 0x238   :  { %920 = vst.msk [vmem:[%s1673_s9] sm:$0xff] %vm919_vm3, %v914_v12 }
 0x23d   :  { %v916_v14 = vpop.f32.mrf.mxu3 }
 0x23e   :  { %v917_v17 = vadd.f32 %v916_v14, %v888_v13 }
 0x240   :  { %922 = vst.msk [vmem:[%s1673_s9 + $0x8] sm:$0x3] %vm921_vm4, %v917_v17 }

</bundles_post_ra>
